<compile_context>
chip_gen: v7x
topology: tpu7x:2x2x1
jax: 0.10.0
libtpu: 0.0.40
codegen_flags: <defaults>
</compile_context>

<pallas_src>
import functools

import jax
import jax.numpy as jnp
from jax.experimental import pallas as pl
from jax.experimental.pallas import tpu as pltpu


def _round_up(a, b):
    return ((a + b - 1) // b) * b


def _default_compute_dtype():
    # bf16 pairwise slabs only where the VPU has a packed bf16 path.
    try:
        kind = jax.devices()[0].device_kind.lower()
    except Exception:
        return jnp.float32
    if ("v6" in kind) or ("v7" in kind) or ("7x" in kind):
        return jnp.bfloat16
    return jnp.float32


def _disco_block_kernel(x_col_ref, e_col_ref, y_col_ref, w_col_ref,
                        x_row_ref, e_row_ref, nw_row_ref,
                        abar_ref, bbar_ref, sab_ref, saa_ref, sbb_ref,
                        wbce_ref, *, inv_n, compute_dtype):
    f32 = jnp.float32
    cdt = compute_dtype

    xc = x_col_ref[...]        # (TM, 1) raw logits (f32)
    ec = e_col_ref[...]        # (TM, 1) mean-centered event (f32)
    xr = x_row_ref[...]        # (1, NP) raw logits
    er = e_row_ref[...]        # (1, NP) mean-centered event
    nwr = nw_row_ref[...]      # (1, NP) normed weights, exactly 0 on padding

    # ---- O(N^2) pairwise slabs, built on the fly; no NxN matrix is stored.
    a = jnp.abs(xc.astype(cdt) - xr.astype(cdt))     # (TM, NP) |x_i - x_j|
    b = jnp.abs(ec.astype(cdt) - er.astype(cdt))     # (TM, NP) |e_i - e_j|
    nwc = nwr.astype(cdt)
    aw = a * nwc               # pre-scaled by column weights, reused 3x
    bw = b * nwc

    def _rowsum(m):            # lane reduction, accumulate in f32
        return jnp.sum(m.astype(f32), axis=1, keepdims=True)

    abar_ref[...] = _rowsum(aw) * inv_n        # (1/N) sum_j nw_j a_ij
    bbar_ref[...] = _rowsum(bw) * inv_n
    sab_ref[...] = _rowsum(aw * b)             # sum_j nw_j a_ij b_ij
    saa_ref[...] = _rowsum(aw * a)             # sum_j nw_j a_ij^2
    sbb_ref[...] = _rowsum(bw * b)             # sum_j nw_j b_ij^2

    # ---- BCE-with-logits, per example (O(TM) work, always f32)
    y = y_col_ref[...]
    w = w_col_ref[...]
    bce = jnp.maximum(xc, 0.0) - xc * y + jnp.log1p(jnp.exp(-jnp.abs(xc)))
    wbce_ref[...] = w * bce


def bce_decorrelated_loss(outputs, labels, event, weights=None, *, lam=0.1,
                          weighted=True, compute_dtype=None, block_rows=None):
    """Pallas implementation of BCEDecorrelatedLoss.forward (power=1 DisCo)."""
    x = jnp.asarray(outputs, jnp.float32).reshape(-1)
    y = jnp.asarray(labels, jnp.float32).reshape(-1)
    e = jnp.asarray(event, jnp.float32).reshape(-1)
    n = int(x.shape[0])
    if (not weighted) or (weights is None):
        w = jnp.ones((n,), jnp.float32)
    else:
        w = jnp.asarray(weights, jnp.float32).reshape(-1)

    if compute_dtype is None:
        compute_dtype = _default_compute_dtype()
    esize = jnp.dtype(compute_dtype).itemsize

    # Lane-dense padding: multiple of 128 lanes; padded examples get weight 0.
    np0 = _round_up(max(n, 128), 128)

    # Row-tile size: keep the live (TM, NP) slab working set well under the
    # scoped VMEM budget (conservative ~16 MiB -> fits v5e/v6e/v7x).
    if block_rows is None:
        budget = 16 * 2**20
        tm = 8
        for cand in (512, 256, 128, 64, 32, 16, 8):
            if 6 * cand * np0 * esize <= budget:
                tm = cand
                break
        tm = min(tm, np0)
    else:
        tm = int(block_rows)
    np_ = _round_up(np0, tm)
    nb = np_ // tm

    # Normalized weights (sum over real examples == n) and shift-invariant
    # centering of the event variable (helps bf16 slabs; exact for the math).
    wsum = jnp.sum(w)
    nw = w * (jnp.float32(n) / wsum)
    e_c = e - jnp.sum(e) / jnp.float32(n)

    pad = np_ - n
    xp = jnp.pad(x, (0, pad))
    yp = jnp.pad(y, (0, pad))
    ep = jnp.pad(e_c, (0, pad))
    wp = jnp.pad(w, (0, pad))
    nwp = jnp.pad(nw, (0, pad))          # exactly 0 on padded entries

    x_col = xp.reshape(np_, 1)
    e_col = ep.reshape(np_, 1)
    y_col = yp.reshape(np_, 1)
    w_col = wp.reshape(np_, 1)
    x_row = xp.reshape(1, np_)
    e_row = ep.reshape(1, np_)
    nw_row = nwp.reshape(1, np_)

    col_spec = pl.BlockSpec((tm, 1), lambda i: (i, 0))
    row_spec = pl.BlockSpec((1, np_), lambda i: (0, 0))
    out_spec = pl.BlockSpec((tm, 1), lambda i: (i, 0))
    out_sds = jax.ShapeDtypeStruct((np_, 1), jnp.float32)

    kern = functools.partial(_disco_block_kernel, inv_n=1.0 / n,
                             compute_dtype=compute_dtype)
    abar, bbar, sab, saa, sbb, wbce = pl.pallas_call(
        kern,
        out_shape=(out_sds,) * 6,
        grid_spec=pltpu.PrefetchScalarGridSpec(
            num_scalar_prefetch=0,
            grid=(nb,),
            in_specs=[col_spec, col_spec, col_spec, col_spec,
                      row_spec, row_spec, row_spec],
            out_specs=(out_spec,) * 6),
        compiler_params=pltpu.CompilerParams(
            dimension_semantics=("parallel",),   # row blocks are independent
            vmem_limit_bytes=32 * 2**20),
    )(x_col, e_col, y_col, w_col, x_row, e_row, nw_row)

    # ---- tiny O(N) combine (algebraic expansion of the double centering);
    # kept outside the kernel so the row-grid can run "parallel" on v7x.
    abar = abar.reshape(-1)
    bbar = bbar.reshape(-1)
    sab = sab.reshape(-1)
    saa = saa.reshape(-1)
    sbb = sbb.reshape(-1)

    nf = jnp.float32(n)
    g_a = jnp.sum(nwp * abar) / nf
    g_b = jnp.sum(nwp * bbar) / nf
    S_ab = jnp.sum(nwp * sab)
    S_aa = jnp.sum(nwp * saa)
    S_bb = jnp.sum(nwp * sbb)
    D_ab = jnp.sum(nwp * abar * bbar)
    D_aa = jnp.sum(nwp * abar * abar)
    D_bb = jnp.sum(nwp * bbar * bbar)

    ab = S_ab / (nf * nf) - 2.0 * D_ab / nf + g_a * g_b
    aa = S_aa / (nf * nf) - 2.0 * D_aa / nf + g_a * g_a
    bb = S_bb / (nf * nf) - 2.0 * D_bb / nf + g_b * g_b
    # Same (un-guarded) division as the PyTorch reference: degenerate/constant
    # inputs produce NaN there too, so semantics are preserved.
    dcorr = ab / jnp.sqrt(aa * bb)

    bce_mean = jnp.sum(wbce) / nf
    return {"bce": bce_mean, "disco": dcorr, "tot": bce_mean + lam * dcorr}


# ---------------- pure-JAX reference (mirrors the PyTorch code) ----------------
def _reference(outputs, labels, event, weights, lam=0.1):
    x = outputs.reshape(-1)
    y = labels.reshape(-1)
    e = event.reshape(-1)
    w = weights.reshape(-1)
    n = x.shape[0]

    bce = jnp.maximum(x, 0.0) - x * y + jnp.log1p(jnp.exp(-jnp.abs(x)))
    bce_mean = jnp.mean(bce * w)

    nw = w * n / jnp.sum(w)
    amat = jnp.abs(x[:, None] - x[None, :])
    bmat = jnp.abs(e[:, None] - e[None, :])
    amatavg = jnp.mean(amat * nw[None, :], axis=1)
    Amat = amat - amatavg[None, :] - amatavg[:, None] + jnp.mean(amatavg * nw)
    bmatavg = jnp.mean(bmat * nw[None, :], axis=1)
    Bmat = bmat - bmatavg[None, :] - bmatavg[:, None] + jnp.mean(bmatavg * nw)
    ABavg = jnp.mean(Amat * Bmat * nw[None, :], axis=1)
    AAavg = jnp.mean(Amat * Amat * nw[None, :], axis=1)
    BBavg = jnp.mean(Bmat * Bmat * nw[None, :], axis=1)
    dcorr = jnp.mean(ABavg * nw) / jnp.sqrt(jnp.mean(AAavg * nw) * jnp.mean(BBavg * nw))
    return {"bce": bce_mean, "disco": dcorr, "tot": bce_mean + lam * dcorr}


if __name__ == "__main__":
    N = 64
    key = jax.random.PRNGKey(0)
    k1, k2, k3, k4 = jax.random.split(key, 4)

    outputs = jax.random.normal(k1, (N, 1), jnp.float32)                     # logits
    labels = jax.random.bernoulli(k2, 0.5, (N, 1)).astype(jnp.float32)
    event = jnp.abs(jax.random.normal(k3, (N,), jnp.float32)) * 50.0 + 80.0  # "mass"
    weights = jax.random.uniform(k4, (N,), jnp.float32, 0.5, 1.5)

    ref = _reference(outputs, labels, event, weights, lam=0.1)

    # 1) exact f32 path — strict check against the pure-JAX reference.
    out = bce_decorrelated_loss(outputs, labels, event, weights, lam=0.1,
                                weighted=True, compute_dtype=jnp.float32)
    jax.block_until_ready(out["tot"])
    for k in ("bce", "disco", "tot"):
        assert jnp.allclose(out[k], ref[k], rtol=1e-3, atol=1e-5), (k, out[k], ref[k])

    # 2) auto path (bf16 pairwise slabs on v6e/v7x, f32 elsewhere) — sanity check.
    out_auto = bce_decorrelated_loss(outputs, labels, event, weights, lam=0.1,
                                     weighted=True)
    jax.block_until_ready(out_auto["tot"])
    assert jnp.allclose(out_auto["bce"], ref["bce"], rtol=1e-3, atol=1e-5), (
        "bce(auto)", out_auto["bce"], ref["bce"])
    assert bool(jnp.isfinite(out_auto["disco"])) and bool(jnp.isfinite(out_auto["tot"]))

    print("KERNEL_OK")
</pallas_src>

<mosaic_0001>
module attributes {stable_mosaic.version = 11 : i64} {
  func.func @_disco_block_kernel(%arg0: i32, %arg1: memref<128x1xf32, #tpu.memory_space<vmem>>, %arg2: memref<128x1xf32, #tpu.memory_space<vmem>>, %arg3: memref<128x1xf32, #tpu.memory_space<vmem>>, %arg4: memref<128x1xf32, #tpu.memory_space<vmem>>, %arg5: memref<1x128xf32, #tpu.memory_space<vmem>>, %arg6: memref<1x128xf32, #tpu.memory_space<vmem>>, %arg7: memref<1x128xf32, #tpu.memory_space<vmem>>, %arg8: memref<128x1xf32, #tpu.memory_space<vmem>>, %arg9: memref<128x1xf32, #tpu.memory_space<vmem>>, %arg10: memref<128x1xf32, #tpu.memory_space<vmem>>, %arg11: memref<128x1xf32, #tpu.memory_space<vmem>>, %arg12: memref<128x1xf32, #tpu.memory_space<vmem>>, %arg13: memref<128x1xf32, #tpu.memory_space<vmem>>) attributes {dimension_semantics = [#tpu.dimension_semantics<parallel>], iteration_bounds = array<i64: 1>, scalar_prefetch = 0 : i64, scratch_operands = 0 : i64, tpu.core_type = #tpu.core_type<tc>, window_params = [{transform_indices = @transform_0, window_bounds = array<i64: 128, 1>}, {transform_indices = @transform_1, window_bounds = array<i64: 128, 1>}, {transform_indices = @transform_2, window_bounds = array<i64: 128, 1>}, {transform_indices = @transform_3, window_bounds = array<i64: 128, 1>}, {pipeline_mode = #tpu.pipeline_mode<synchronous>, transform_indices = @transform_4, window_bounds = array<i64: 1, 128>}, {pipeline_mode = #tpu.pipeline_mode<synchronous>, transform_indices = @transform_5, window_bounds = array<i64: 1, 128>}, {pipeline_mode = #tpu.pipeline_mode<synchronous>, transform_indices = @transform_6, window_bounds = array<i64: 1, 128>}, {transform_indices = @transform_7, window_bounds = array<i64: 128, 1>}, {transform_indices = @transform_8, window_bounds = array<i64: 128, 1>}, {transform_indices = @transform_9, window_bounds = array<i64: 128, 1>}, {transform_indices = @transform_10, window_bounds = array<i64: 128, 1>}, {transform_indices = @transform_11, window_bounds = array<i64: 128, 1>}, {transform_indices = @transform_12, window_bounds = array<i64: 128, 1>}]} {
    %c0 = arith.constant 0 : index
    %c0_0 = arith.constant 0 : index
    %0 = vector.load %arg1[%c0, %c0_0] : memref<128x1xf32, #tpu.memory_space<vmem>>, vector<128x1xf32>
    %c0_1 = arith.constant 0 : index
    %c0_2 = arith.constant 0 : index
    %1 = vector.load %arg2[%c0_1, %c0_2] : memref<128x1xf32, #tpu.memory_space<vmem>>, vector<128x1xf32>
    %c0_3 = arith.constant 0 : index
    %c0_4 = arith.constant 0 : index
    %2 = vector.load %arg5[%c0_3, %c0_4] : memref<1x128xf32, #tpu.memory_space<vmem>>, vector<1x128xf32>
    %c0_5 = arith.constant 0 : index
    %c0_6 = arith.constant 0 : index
    %3 = vector.load %arg6[%c0_5, %c0_6] : memref<1x128xf32, #tpu.memory_space<vmem>>, vector<1x128xf32>
    %c0_7 = arith.constant 0 : index
    %c0_8 = arith.constant 0 : index
    %4 = vector.load %arg7[%c0_7, %c0_8] : memref<1x128xf32, #tpu.memory_space<vmem>>, vector<1x128xf32>
    %5 = vector.broadcast %0 : vector<128x1xf32> to vector<128x128xf32>
    %6 = vector.broadcast %2 : vector<1x128xf32> to vector<128x128xf32>
    %7 = arith.subf %5, %6 : vector<128x128xf32>
    %8 = math.absf %7 : vector<128x128xf32>
    %9 = vector.broadcast %1 : vector<128x1xf32> to vector<128x128xf32>
    %10 = vector.broadcast %3 : vector<1x128xf32> to vector<128x128xf32>
    %11 = arith.subf %9, %10 : vector<128x128xf32>
    %12 = math.absf %11 : vector<128x128xf32>
    %13 = vector.broadcast %4 : vector<1x128xf32> to vector<128x128xf32>
    %14 = arith.mulf %8, %13 : vector<128x128xf32>
    %15 = vector.broadcast %4 : vector<1x128xf32> to vector<128x128xf32>
    %16 = arith.mulf %12, %15 : vector<128x128xf32>
    %cst = arith.constant dense<0.000000e+00> : vector<128xf32>
    %17 = vector.multi_reduction <add>, %14, %cst [1] : vector<128x128xf32> to vector<128xf32>
    %18 = vector.shape_cast %17 : vector<128xf32> to vector<128x1xf32>
    %cst_9 = arith.constant 1.562500e-02 : f32
    %19 = vector.broadcast %cst_9 : f32 to vector<128x1xf32>
    %20 = arith.mulf %18, %19 : vector<128x1xf32>
    %c0_10 = arith.constant 0 : index
    %c0_11 = arith.constant 0 : index
    %21 = vector.load %arg8[%c0_10, %c0_11] : memref<128x1xf32, #tpu.memory_space<vmem>>, vector<128x1xf32>
    tpu.vector_store %arg8[%c0_10, %c0_11], %20 {strides = array<i32>} : memref<128x1xf32, #tpu.memory_space<vmem>>, vector<128x1xf32>,
    %cst_12 = arith.constant dense<0.000000e+00> : vector<128xf32>
    %22 = vector.multi_reduction <add>, %16, %cst_12 [1] : vector<128x128xf32> to vector<128xf32>
    %23 = vector.shape_cast %22 : vector<128xf32> to vector<128x1xf32>
    %cst_13 = arith.constant 1.562500e-02 : f32
    %24 = vector.broadcast %cst_13 : f32 to vector<128x1xf32>
    %25 = arith.mulf %23, %24 : vector<128x1xf32>
    %c0_14 = arith.constant 0 : index
    %c0_15 = arith.constant 0 : index
    %26 = vector.load %arg9[%c0_14, %c0_15] : memref<128x1xf32, #tpu.memory_space<vmem>>, vector<128x1xf32>
    tpu.vector_store %arg9[%c0_14, %c0_15], %25 {strides = array<i32>} : memref<128x1xf32, #tpu.memory_space<vmem>>, vector<128x1xf32>,
    %27 = arith.mulf %14, %12 : vector<128x128xf32>
    %cst_16 = arith.constant dense<0.000000e+00> : vector<128xf32>
    %28 = vector.multi_reduction <add>, %27, %cst_16 [1] : vector<128x128xf32> to vector<128xf32>
    %29 = vector.shape_cast %28 : vector<128xf32> to vector<128x1xf32>
    %c0_17 = arith.constant 0 : index
    %c0_18 = arith.constant 0 : index
    %30 = vector.load %arg10[%c0_17, %c0_18] : memref<128x1xf32, #tpu.memory_space<vmem>>, vector<128x1xf32>
    tpu.vector_store %arg10[%c0_17, %c0_18], %29 {strides = array<i32>} : memref<128x1xf32, #tpu.memory_space<vmem>>, vector<128x1xf32>,
    %31 = arith.mulf %14, %8 : vector<128x128xf32>
    %cst_19 = arith.constant dense<0.000000e+00> : vector<128xf32>
    %32 = vector.multi_reduction <add>, %31, %cst_19 [1] : vector<128x128xf32> to vector<128xf32>
    %33 = vector.shape_cast %32 : vector<128xf32> to vector<128x1xf32>
    %c0_20 = arith.constant 0 : index
    %c0_21 = arith.constant 0 : index
    %34 = vector.load %arg11[%c0_20, %c0_21] : memref<128x1xf32, #tpu.memory_space<vmem>>, vector<128x1xf32>
    tpu.vector_store %arg11[%c0_20, %c0_21], %33 {strides = array<i32>} : memref<128x1xf32, #tpu.memory_space<vmem>>, vector<128x1xf32>,
    %35 = arith.mulf %16, %12 : vector<128x128xf32>
    %cst_22 = arith.constant dense<0.000000e+00> : vector<128xf32>
    %36 = vector.multi_reduction <add>, %35, %cst_22 [1] : vector<128x128xf32> to vector<128xf32>
    %37 = vector.shape_cast %36 : vector<128xf32> to vector<128x1xf32>
    %c0_23 = arith.constant 0 : index
    %c0_24 = arith.constant 0 : index
    %38 = vector.load %arg12[%c0_23, %c0_24] : memref<128x1xf32, #tpu.memory_space<vmem>>, vector<128x1xf32>
    tpu.vector_store %arg12[%c0_23, %c0_24], %37 {strides = array<i32>} : memref<128x1xf32, #tpu.memory_space<vmem>>, vector<128x1xf32>,
    %c0_25 = arith.constant 0 : index
    %c0_26 = arith.constant 0 : index
    %39 = vector.load %arg3[%c0_25, %c0_26] : memref<128x1xf32, #tpu.memory_space<vmem>>, vector<128x1xf32>
    %c0_27 = arith.constant 0 : index
    %c0_28 = arith.constant 0 : index
    %40 = vector.load %arg4[%c0_27, %c0_28] : memref<128x1xf32, #tpu.memory_space<vmem>>, vector<128x1xf32>
    %cst_29 = arith.constant 0.000000e+00 : f32
    %41 = vector.broadcast %cst_29 : f32 to vector<128x1xf32>
    %42 = arith.maximumf %0, %41 : vector<128x1xf32>
    %43 = arith.mulf %0, %39 : vector<128x1xf32>
    %44 = arith.subf %42, %43 : vector<128x1xf32>
    %45 = math.absf %0 : vector<128x1xf32>
    %cst_30 = arith.constant 0.000000e+00 : f32
    %46 = vector.broadcast %cst_30 : f32 to vector<128x1xf32>
    %47 = arith.subf %46, %45 : vector<128x1xf32>
    %48 = math.exp %47 : vector<128x1xf32>
    %49 = math.log1p %48 : vector<128x1xf32>
    %50 = arith.addf %44, %49 : vector<128x1xf32>
    %51 = arith.mulf %40, %50 : vector<128x1xf32>
    %c0_31 = arith.constant 0 : index
    %c0_32 = arith.constant 0 : index
    %52 = vector.load %arg13[%c0_31, %c0_32] : memref<128x1xf32, #tpu.memory_space<vmem>>, vector<128x1xf32>
    tpu.vector_store %arg13[%c0_31, %c0_32], %51 {strides = array<i32>} : memref<128x1xf32, #tpu.memory_space<vmem>>, vector<128x1xf32>,
    return
  }
  func.func @transform_0(%arg0: i32) -> (i32, i32) {
    %c0_i32 = arith.constant 0 : i32
    %c0_i32_0 = arith.constant 0 : i32
    return %arg0, %c0_i32 : i32, i32
  }
  func.func @transform_1(%arg0: i32) -> (i32, i32) {
    %c0_i32 = arith.constant 0 : i32
    %c0_i32_0 = arith.constant 0 : i32
    return %arg0, %c0_i32 : i32, i32
  }
  func.func @transform_2(%arg0: i32) -> (i32, i32) {
    %c0_i32 = arith.constant 0 : i32
    %c0_i32_0 = arith.constant 0 : i32
    return %arg0, %c0_i32 : i32, i32
  }
  func.func @transform_3(%arg0: i32) -> (i32, i32) {
    %c0_i32 = arith.constant 0 : i32
    %c0_i32_0 = arith.constant 0 : i32
    return %arg0, %c0_i32 : i32, i32
  }
  func.func @transform_4(%arg0: i32) -> (i32, i32) {
    %c0_i32 = arith.constant 0 : i32
    %c0_i32_0 = arith.constant 0 : i32
    %c0_i32_1 = arith.constant 0 : i32
    return %c0_i32, %c0_i32_0 : i32, i32
  }
  func.func @transform_5(%arg0: i32) -> (i32, i32) {
    %c0_i32 = arith.constant 0 : i32
    %c0_i32_0 = arith.constant 0 : i32
    %c0_i32_1 = arith.constant 0 : i32
    return %c0_i32, %c0_i32_0 : i32, i32
  }
  func.func @transform_6(%arg0: i32) -> (i32, i32) {
    %c0_i32 = arith.constant 0 : i32
    %c0_i32_0 = arith.constant 0 : i32
    %c0_i32_1 = arith.constant 0 : i32
    return %c0_i32, %c0_i32_0 : i32, i32
  }
  func.func @transform_7(%arg0: i32) -> (i32, i32) {
    %c0_i32 = arith.constant 0 : i32
    %c0_i32_0 = arith.constant 0 : i32
    return %arg0, %c0_i32 : i32, i32
  }
  func.func @transform_8(%arg0: i32) -> (i32, i32) {
    %c0_i32 = arith.constant 0 : i32
    %c0_i32_0 = arith.constant 0 : i32
    return %arg0, %c0_i32 : i32, i32
  }
  func.func @transform_9(%arg0: i32) -> (i32, i32) {
    %c0_i32 = arith.constant 0 : i32
    %c0_i32_0 = arith.constant 0 : i32
    return %arg0, %c0_i32 : i32, i32
  }
  func.func @transform_10(%arg0: i32) -> (i32, i32) {
    %c0_i32 = arith.constant 0 : i32
    %c0_i32_0 = arith.constant 0 : i32
    return %arg0, %c0_i32 : i32, i32
  }
  func.func @transform_11(%arg0: i32) -> (i32, i32) {
    %c0_i32 = arith.constant 0 : i32
    %c0_i32_0 = arith.constant 0 : i32
    return %arg0, %c0_i32 : i32, i32
  }
  func.func @transform_12(%arg0: i32) -> (i32, i32) {
    %c0_i32 = arith.constant 0 : i32
    %c0_i32_0 = arith.constant 0 : i32
    return %arg0, %c0_i32 : i32, i32
  }
}

</mosaic_0001>

<bundles_post_ra>
// kernel: tpu_custom_call.1
= control target key start
LH: loop header
LB: loop body
LE: loop exit
PB: predicated region body
PF: predicated region fallthrough
CT: control target
= control target key end

     0   :  { %v1092_v0 = vmov 0   ;;  %vm389_vm2 = vcmask 7168   ;;  %s2244_s0 = inlined_call_operand.vmem [shape: f32[128,1], index: 0, kind: input, shape index: {}]   ;;  %s2245_s2 = inlined_call_operand.vmem [shape: f32[128,1], index: 2, kind: input, shape index: {}]   ;;  %s2246_s1 = inlined_call_operand.vmem [shape: f32[128,1], index: 1, kind: input, shape index: {}]   ;;  %s2247_s3 = inlined_call_operand.vmem [shape: f32[128,1], index: 3, kind: input, shape index: {}]   ;;  %s2248_s12 = inlined_call_operand.vmem [shape: f32[128,1], index: 12, kind: output, shape index: {5}]   ;;  %s2249_s4 = inlined_call_operand.vmem [shape: f32[1,128], index: 4, kind: input, shape index: {}]   ;;  %s2250_s6 = inlined_call_operand.vmem [shape: f32[1,128], index: 6, kind: input, shape index: {}]   ;;  %s2251_s5 = inlined_call_operand.vmem [shape: f32[1,128], index: 5, kind: input, shape index: {}]   ;;  %s2252_s7 = inlined_call_operand.vmem [shape: f32[128,1], index: 7, kind: output, shape index: {0}]   ;;  %s2253_s8 = inlined_call_operand.vmem [shape: f32[128,1], index: 8, kind: output, shape index: {1}]   ;;  %s2254_s9 = inlined_call_operand.vmem [shape: f32[128,1], index: 9, kind: output, shape index: {2}]   ;;  %s2255_s10 = inlined_call_operand.vmem [shape: f32[128,1], index: 10, kind: output, shape index: {3}]   ;;  %s2256_s11 = inlined_call_operand.vmem [shape: f32[128,1], index: 11, kind: output, shape index: {4}]  }
   0x1   :  { %1027 = vset.pattern.permute.xlu1 %v1092_v0  ;;  %1026 = vset.pattern.permute.xlu0 %v1092_v0  ;;  %v34_v1 = vld [vmem:[%s2244_s0 + $0x10] sm:$0xff]  ;;  %v1164_v3 = vld [vmem:[%s2244_s0] sm:$0xff]  ;;  %v35_v5 = vld [vmem:[%s2244_s0 + $0x18] sm:$0xff] }
   0x2   :  { %79 = vperm.xlu1 %1027, %v34_v1   ;;  %v744_v2 = vand.u32 2147483647, %v34_v1  ;;  %69 = vperm.xlu0 %1026, %v1164_v3   ;;  %v742_v4 = vand.u32 2147483647, %v1164_v3  ;;  %v1174_v7 = vld [vmem:[%s2244_s0 + $0x8] sm:$0xff]  ;;  %v664_v12 = vld [vmem:[%s2245_s2 + $0x10] sm:$0xff] }
   0x3   :  { %v745_v9 = vand.u32 2147483647, %v35_v5  ;;  %v743_v11 = vand.u32 2147483647, %v1174_v7  ;;  %v1184_v15 = vld [vmem:[%s2244_s0 + $0x28] sm:$0xff]  ;;  %v662_v16 = vld [vmem:[%s2245_s2] sm:$0xff]  ;;  %v712_v24 = vmul.f32 %v664_v12, %v34_v1 }
   0x4   :  { %v760_v6 = vsub.f32 0.0, %v744_v2  ;;  %v758_v8 = vsub.f32 0.0, %v742_v4  ;;  %v747_v18 = vand.u32 2147483647, %v1184_v15  ;;  %v1193_v19 = vld [vmem:[%s2244_s0 + $0x20] sm:$0xff]  ;;  %v696_v20 = vmax.f32 %v34_v1, 0.0 }
   0x5   :  { %v761_v14 = vsub.f32 0.0, %v745_v9  ;;  %v759_v17 = vsub.f32 0.0, %v743_v11  ;;  %v694_v21 = vmax.f32 %v1164_v3, 0.0  ;;  %v665_v22 = vld [vmem:[%s2245_s2 + $0x18] sm:$0xff]  ;;  %v746_v27 = vand.u32 2147483647, %v1193_v19 }
   0x6   :  { %v778_v10 = vmul.f32 1.442695, %v760_v6  ;;  %84 = vperm.xlu1 %1027, %v35_v5   ;;  %v774_v13 = vmul.f32 1.442695, %v758_v8  ;;  %74 = vperm.xlu0 %1026, %v1174_v7   ;;  %v763_v26 = vsub.f32 0.0, %v747_v18  ;;  %v1204_v28 = vld [vmem:[%s2244_s0 + $0x38] sm:$0xff]  ;;  %v710_v29 = vmul.f32 %v662_v16, %v1164_v3 }
   0x7   :  { %v780_v23 = vmul.f32 1.442695, %v761_v14  ;;  %v776_v25 = vmul.f32 1.442695, %v759_v17  ;;  %v697_v30 = vmax.f32 %v35_v5, 0.0  ;;  %v713_v32 = vmul.f32 %v665_v22, %v35_v5  ;;  %v663_v33 = vld [vmem:[%s2245_s2 + $0x8] sm:$0xff] }
   0x8   :  { %1028 = vpow2.f32 %v778_v10  ;;  %v749_v31 = vand.u32 2147483647, %v1204_v28  ;;  %v667_v34 = vld [vmem:[%s2245_s2 + $0x28] sm:$0xff]  ;;  %v784_v35 = vmul.f32 1.442695, %v763_v26  ;;  %v762_v36 = vsub.f32 0.0, %v746_v27 }
   0x9   :  { %1030 = vpow2.f32 %v774_v13  ;;  %v38_v37 = vld [vmem:[%s2244_s0 + $0x30] sm:$0xff]  ;;  %v695_v38 = vmax.f32 %v1174_v7, 0.0  ;;  %v699_v39 = vmax.f32 %v1184_v15, 0.0  ;;  %v1220_v41 = vsub.f32 %v696_v20, %v712_v24  ;;  %v666_v42 = vld [vmem:[%s2245_s2 + $0x20] sm:$0xff]  ;;  %v1229_v45 = vld [vmem:[%s2244_s0 + $0x48] sm:$0xff] }
   0xa   :  { %94 = vperm.xlu1 %1027, %v1184_v15   ;;  %1032 = vpow2.f32 %v780_v23  ;;  %89 = vperm.xlu0 %1026, %v1193_v19   ;;  %v765_v40 = vsub.f32 0.0, %v749_v31  ;;  %v782_v43 = vmul.f32 1.442695, %v762_v36  ;;  %v748_v44 = vand.u32 2147483647, %v38_v37  ;;  %v669_v48 = vld [vmem:[%s2245_s2 + $0x38] sm:$0xff] }
   0xb   :  { %1034 = vpow2.f32 %v776_v25  ;;  %v711_v46 = vmul.f32 %v663_v33, %v1174_v7  ;;  %v715_v47 = vmul.f32 %v667_v34, %v1184_v15  ;;  %v668_v50 = vld [vmem:[%s2245_s2 + $0x30] sm:$0xff]  ;;  %v751_v51 = vand.u32 2147483647, %v1229_v45  ;;  %v1247_v55 = vld [vmem:[%s2244_s0 + $0x40] sm:$0xff]  ;;  %v1262_v5 = vld [vmem:[%s2244_s0 + $0x58] sm:$0xff] }
   0xc   :  { %1036 = vpow2.f32 %v784_v35  ;;  %v788_v49 = vmul.f32 1.442695, %v765_v40  ;;  %v1240_v52 = vsub.f32 %v694_v21, %v710_v29  ;;  %v1242_v53 = vsub.f32 %v697_v30, %v713_v32  ;;  %v1267_v9 = vld [vmem:[%s2244_s0 + $0x50] sm:$0xff]  ;;  %v1280_v18 = vld [vmem:[%s2244_s0 + $0x68] sm:$0xff]  ;;  %v1290_v27 = vld [vmem:[%s2244_s0 + $0x60] sm:$0xff] }
   0xd   :  { %1038 = vpow2.f32 %v782_v43  ;;  %v764_v54 = vsub.f32 0.0, %v748_v44  ;;  %v698_v56 = vmax.f32 %v1193_v19, 0.0  ;;  %v714_v57 = vmul.f32 %v666_v42, %v1193_v19  ;;  %v1299_v40 = vld [vmem:[%s2244_s0 + $0x78] sm:$0xff]  ;;  %v679_v43 = vld [vmem:[%s2247_s3 + $0x8] sm:$0xff] }
   0xe   :  { %104 = vperm.xlu1 %1027, %v1204_v28   ;;  %99 = vperm.xlu0 %1026, %v38_v37   ;;  %v701_v58 = vmax.f32 %v1204_v28, 0.0  ;;  %1040 = vpow2.f32 %v788_v49  ;;  %v717_v60 = vmul.f32 %v669_v48, %v1204_v28  ;;  %v700_v61 = vmax.f32 %v38_v37, 0.0  ;;  %v51_v25 = vld [vmem:[%s2246_s1 + $0x18] sm:$0xff] }
   0xf   :  { %v716_v62 = vmul.f32 %v668_v50, %v38_v37  ;;  %v786_v63 = vmul.f32 1.442695, %v764_v54  ;;  %v1254_v2 = vsub.f32 %v695_v38, %v711_v46  ;;  %v1256_v3 = vsub.f32 %v699_v39, %v715_v47  ;;  %v1308_v47 = vld [vmem:[%s2244_s0 + $0x70] sm:$0xff] }
  0x10   :  { %v767_v4 = vsub.f32 0.0, %v751_v51  ;;  %v1269_v12 = vsub.f32 %v698_v56, %v714_v57  ;;  %v750_v13 = vand.u32 2147483647, %v1247_v55  ;;  %v1272_v16 = vsub.f32 %v701_v58, %v717_v60 }
  0x11   :  { %1042 = vpow2.f32 %v786_v63  ;;  %v1274_v17 = vsub.f32 %v700_v61, %v716_v62  ;;  %v49_v62 = vld [vmem:[%s2246_s1 + $0x8] sm:$0xff] }
  0x12   :  { %v1029_v59 = vpop.eup %1028  ;;  %114 = vperm.xlu1 %1027, %v1229_v45   ;;  %109 = vperm.xlu0 %1026, %v1247_v55   ;;  %v792_v22 = vmul.f32 1.442695, %v767_v4  ;;  %v766_v30 = vsub.f32 0.0, %v750_v13 }
  0x13   :  { %v1031_v0 = vpop.eup %1030  ;;  %v824_v1 = vadd.f32 1.0, %v1029_v59  ;;  %v827_v6 = vmul.f32 -0.5, %v1029_v59  ;;  %v830_v7 = vand.u32 2147483647, %v1029_v59 }
  0x14   :  { %v806_v8 = vadd.f32 1.0, %v1031_v0  ;;  %v1033_v10 = vpop.eup %1032  ;;  %v809_v11 = vmul.f32 -0.5, %v1031_v0  ;;  %v812_v19 = vand.u32 2147483647, %v1031_v0 }
  0x15   :  { %1044 = vlog2.f32 %v824_v1  ;;  %v1035_v14 = vpop.eup %1034  ;;  %v833_v15 = vadd.f32 1.0, %v1033_v10  ;;  %v836_v20 = vmul.f32 -0.5, %v1033_v10  ;;  %v828_v24 = vadd.f32 1.0, %v827_v6 }
  0x16   :  { %1046 = vlog2.f32 %v806_v8  ;;  %124 = vperm.xlu1 %1027, %v1262_v5   ;;  %v815_v21 = vadd.f32 1.0, %v1035_v14  ;;  %119 = vperm.xlu0 %1026, %v1267_v9   ;;  %v1037_v23 = vpop.eup %1036  ;;  %vm1283_vm0 = vcmp.lt.f32.partialorder %v830_v7, 0.0004427343  ;;  %v818_v26 = vmul.f32 -0.5, %v1035_v14  ;;  %v48_v7 = vld [vmem:[%s2246_s1] sm:$0xff]  ;;  %v680_v8 = vld [vmem:[%s2247_s3 + $0x10] sm:$0xff] }
  0x17   :  { %1048 = vlog2.f32 %v833_v15  ;;  %v810_v28 = vadd.f32 1.0, %v809_v11  ;;  %v851_v29 = vadd.f32 1.0, %v1037_v23  ;;  %v1039_v31 = vpop.eup %1038  ;;  %v837_v32 = vadd.f32 1.0, %v836_v20  ;;  %v685_v11 = vld [vmem:[%s2247_s3 + $0x38] sm:$0xff] }
  0x18   :  { %1050 = vlog2.f32 %v815_v21  ;;  %v839_v33 = vand.u32 2147483647, %v1033_v10  ;;  %v821_v34 = vand.u32 2147483647, %v1035_v14  ;;  %v854_v35 = vmul.f32 -0.5, %v1037_v23  ;;  %v1293_v36 = vpop.eup %1040 }
  0x19   :  { %v819_v37 = vadd.f32 1.0, %v818_v26  ;;  %1052 = vlog2.f32 %v851_v29  ;;  %v842_v38 = vadd.f32 1.0, %v1039_v31  ;;  %v845_v39 = vmul.f32 -0.5, %v1039_v31 }
  0x1a   :  { %134 = vperm.xlu1 %1027, %v1280_v18   ;;  %129 = vperm.xlu0 %1026, %v1290_v27   ;;  %v829_v42 = vmul.f32 %v1029_v59, %v828_v24  ;;  %vm1301_vm1 = vcmp.lt.f32.partialorder %v812_v19, 0.0004427343  ;;  %v855_v44 = vadd.f32 1.0, %v854_v35  ;;  %v857_v46 = vand.u32 2147483647, %v1037_v23  ;;  %v678_v24 = vld [vmem:[%s2247_s3] sm:$0xff] }
  0x1b   :  { %v811_v48 = vmul.f32 %v1031_v0, %v810_v28  ;;  %1054 = vlog2.f32 %v842_v38  ;;  %v848_v49 = vand.u32 2147483647, %v1039_v31  ;;  %v869_v50 = vadd.f32 1.0, %v1293_v36  ;;  %v1311_v51 = vpop.eup %1042 }
  0x1c   :  { %v838_v54 = vmul.f32 %v1033_v10, %v837_v32  ;;  %vm1313_vm3 = vcmp.lt.f32.partialorder %v839_v33, 0.0004427343  ;;  %vm1317_vm4 = vcmp.lt.f32.partialorder %v821_v34, 0.0004427343  ;;  %1056 = vpow2.f32 %v792_v22 }
  0x1d   :  { %v820_v59 = vmul.f32 %v1035_v14, %v819_v37  ;;  %v846_v60 = vadd.f32 1.0, %v845_v39  ;;  %1058 = vlog2.f32 %v869_v50  ;;  %v860_v61 = vadd.f32 1.0, %v1311_v51 }
  0x1e   :  { %144 = vperm.xlu1 %1027, %v1299_v40   ;;  %139 = vperm.xlu0 %1026, %v1308_v47   ;;  %v856_v1 = vmul.f32 %v1037_v23, %v855_v44  ;;  %vm1327_vm5 = vcmp.lt.f32.partialorder %v857_v46, 0.0004427343  ;;  %v872_v6 = vmul.f32 -0.5, %v1293_v36  ;;  %vm1338_vm6 = vcmp.lt.f32.partialorder %v848_v49, 0.0004427343 }
  0x1f   :  { %v1045_v58 = vpop.eup %1044  ;;  %1060 = vlog2.f32 %v860_v61  ;;  %v863_v13 = vmul.f32 -0.5, %v1311_v51  ;;  %v875_v19 = vand.u32 2147483647, %v1293_v36  ;;  %v790_v20 = vmul.f32 1.442695, %v766_v30 }
  0x20   :  { %v1047_v63 = vpop.eup %1046  ;;  %v826_v0 = vmul.f32 0.6931472, %v1045_v58  ;;  %v753_v21 = vand.u32 2147483647, %v1262_v5  ;;  %v847_v29 = vmul.f32 %v1039_v31, %v846_v60  ;;  %v873_v33 = vadd.f32 1.0, %v872_v6  ;;  %v681_v31 = vld [vmem:[%s2247_s3 + $0x18] sm:$0xff] }
  0x21   :  { %v808_v10 = vmul.f32 0.6931472, %v1047_v63  ;;  %v1049_v14 = vpop.eup %1048  ;;  %1062 = vpow2.f32 %v790_v20  ;;  %v864_v38 = vadd.f32 1.0, %v863_v13  ;;  %vm1379_vm7 = vcmp.lt.f32.partialorder %v875_v19, 0.0004427343 }
  0x22   :  { %v832_v15 = vsel %vm1283_vm0, %v829_v42, %v826_v0  ;;  %192 = vperm.xlu1 %1027, %v49_v62   ;;  %v1051_v22 = vpop.eup %1050  ;;  %v835_v28 = vmul.f32 0.6931472, %v1049_v14  ;;  %187 = vperm.xlu0 %1026, %v48_v7   ;;  %v769_v39 = vsub.f32 0.0, %v753_v21  ;;  %v874_v61 = vmul.f32 %v1293_v36, %v873_v33  ;;  %v52_v62 = vld [vmem:[%s2246_s1 + $0x20] sm:$0xff]  ;;  %v54_v21 = vld [vmem:[%s2246_s1 + $0x30] sm:$0xff] }
  0x23   :  { %v952_v23 = vadd.f32 %v832_v15, %v1220_v41  ;;  %v814_v26 = vsel %vm1301_vm1, %v811_v48, %v808_v10  ;;  %v817_v32 = vmul.f32 0.6931472, %v1051_v22  ;;  %v50_v41 = vld [vmem:[%s2246_s1 + $0x10] sm:$0xff]  ;;  %v1053_v34 = vpop.eup %1052  ;;  %v53_v48 = vld [vmem:[%s2246_s1 + $0x28] sm:$0xff]  ;;  %v682_v36 = vld [vmem:[%s2247_s3 + $0x20] sm:$0xff]  ;;  %v865_v10 = vmul.f32 %v1311_v51, %v864_v38 }
  0x24   :  { %v950_v30 = vadd.f32 %v814_v26, %v1240_v52  ;;  %v841_v37 = vsel %vm1313_vm3, %v838_v54, %v835_v28  ;;  %v853_v46 = vmul.f32 0.6931472, %v1053_v34  ;;  %v866_v54 = vand.u32 2147483647, %v1311_v51  ;;  %v55_v51 = vld [vmem:[%s2246_s1 + $0x38] sm:$0xff]  ;;  %v684_v28 = vld [vmem:[%s2247_s3 + $0x30] sm:$0xff] }
  0x25   :  { %v968_v35 = vmul.f32 %v952_v23, %v680_v8  ;;  %v953_v52 = vadd.f32 %v841_v37, %v1242_v53  ;;  %v823_v44 = vsel %vm1317_vm4, %v820_v59, %v817_v32  ;;  %v1055_v49 = vpop.eup %1054  ;;  %v796_v56 = vmul.f32 1.442695, %v769_v39  ;;  %v56_v38 = vld [vmem:[%s2246_s1 + $0x40] sm:$0xff]  ;;  %v673_v15 = vld [vmem:[%s2245_s2 + $0x58] sm:$0xff] }
  0x26   :  { %v966_v42 = vmul.f32 %v950_v30, %v678_v24  ;;  %202 = vperm.xlu1 %1027, %v51_v25   ;;  %v951_v53 = vadd.f32 %v823_v44, %v1254_v2  ;;  %197 = vperm.xlu0 %1026, %v50_v41   ;;  %v1384_v57 = vpop.eup %1056  ;;  %v683_v2 = vld [vmem:[%s2247_s3 + $0x28] sm:$0xff]  ;;  %v859_v59 = vsel %vm1327_vm5, %v856_v1, %v853_v46  ;;  %v844_v60 = vmul.f32 0.6931472, %v1055_v49  ;;  %v670_v49 = vld [vmem:[%s2245_s2 + $0x40] sm:$0xff] }
  0x27   :  { %984 = vst.msk [vmem:[%s2248_s12 + $0x10] sm:$0xff] %vm389_vm2, %v968_v35  ;;  %v969_v58 = vmul.f32 %v953_v52, %v681_v31  ;;  %v1059_v63 = vpop.eup %1058  ;;  %v955_v6 = vadd.f32 %v859_v59, %v1256_v3  ;;  %v887_v7 = vadd.f32 1.0, %v1384_v57  ;;  %v752_v8 = vand.u32 2147483647, %v1267_v9  ;;  %v671_v25 = vld [vmem:[%s2245_s2 + $0x48] sm:$0xff] }
  0x28   :  { %982 = vst.msk [vmem:[%s2248_s12] sm:$0xff] %vm389_vm2, %v966_v42  ;;  %v967_v0 = vmul.f32 %v951_v53, %v679_v43  ;;  %v850_v1 = vsel %vm1338_vm6, %v847_v29, %v844_v60  ;;  %v871_v4 = vmul.f32 0.6931472, %v1059_v63  ;;  %1064 = vpow2.f32 %v796_v56  ;;  %v57_v41 = vld [vmem:[%s2246_s1 + $0x48] sm:$0xff] }
  0x29   :  { %985 = vst.msk [vmem:[%s2248_s12 + $0x18] sm:$0xff] %vm389_vm2, %v969_v58  ;;  %v1061_v3 = vpop.eup %1060  ;;  %v971_v13 = vmul.f32 %v955_v6, %v683_v2  ;;  %v954_v14 = vadd.f32 %v850_v1, %v1269_v12  ;;  %vm1417_vm8 = vcmp.lt.f32.partialorder %v866_v54, 0.0004427343  ;;  %1066 = vlog2.f32 %v887_v7  ;;  %v58_v54 = vld [vmem:[%s2246_s1 + $0x50] sm:$0xff] }
  0x2a   :  { %212 = vperm.xlu1 %1027, %v53_v48   ;;  %983 = vst.msk [vmem:[%s2248_s12 + $0x8] sm:$0xff] %vm389_vm2, %v967_v0  ;;  %207 = vperm.xlu0 %1026, %v52_v62   ;;  %v877_v19 = vsel %vm1379_vm7, %v874_v61, %v871_v4  ;;  %v862_v20 = vmul.f32 0.6931472, %v1061_v3  ;;  %v890_v12 = vmul.f32 -0.5, %v1384_v57  ;;  %v768_v24 = vsub.f32 0.0, %v752_v8  ;;  %v61_v8 = vld [vmem:[%s2246_s1 + $0x68] sm:$0xff] }
  0x2b   :  { %987 = vst.msk [vmem:[%s2248_s12 + $0x28] sm:$0xff] %vm389_vm2, %v971_v13  ;;  %v970_v22 = vmul.f32 %v954_v14, %v682_v36  ;;  %v957_v23 = vadd.f32 %v877_v19, %v1272_v16  ;;  %v1438_v26 = vpop.eup %1062  ;;  %v755_v30 = vand.u32 2147483647, %v1280_v18  ;;  %v703_v34 = vmax.f32 %v1229_v45, 0.0  ;;  %v687_v36 = vld [vmem:[%s2247_s3 + $0x48] sm:$0xff] }
  0x2c   :  { %v868_v29 = vsel %vm1417_vm8, %v865_v10, %v862_v20  ;;  %v878_v33 = vadd.f32 1.0, %v1438_v26  ;;  %v891_v35 = vadd.f32 1.0, %v890_v12  ;;  %v794_v31 = vmul.f32 1.442695, %v768_v24  ;;  %v60_v10 = vld [vmem:[%s2246_s1 + $0x60] sm:$0xff] }
  0x2d   :  { %986 = vst.msk [vmem:[%s2248_s12 + $0x20] sm:$0xff] %vm389_vm2, %v970_v22  ;;  %v973_v16 = vmul.f32 %v957_v23, %v685_v11  ;;  %v956_v32 = vadd.f32 %v868_v29, %v1274_v17  ;;  %v771_v37 = vsub.f32 0.0, %v755_v30  ;;  %v719_v39 = vmul.f32 %v671_v25, %v1229_v45  ;;  %v59_v45 = vld [vmem:[%s2246_s1 + $0x58] sm:$0xff] }
  0x2e   :  { %222 = vperm.xlu1 %1027, %v55_v51   ;;  %217 = vperm.xlu0 %1026, %v54_v21   ;;  %v893_v42 = vand.u32 2147483647, %v1384_v57  ;;  %1068 = vlog2.f32 %v878_v33  ;;  %v881_v52 = vmul.f32 -0.5, %v1438_v26  ;;  %v754_v44 = vand.u32 2147483647, %v1290_v27  ;;  %v63_v21 = vld [vmem:[%s2246_s1 + $0x78] sm:$0xff] }
  0x2f   :  { %989 = vst.msk [vmem:[%s2248_s12 + $0x38] sm:$0xff] %vm389_vm2, %v973_v16  ;;  %v972_v17 = vmul.f32 %v956_v32, %v684_v28  ;;  %1070 = vpow2.f32 %v794_v31  ;;  %v800_v43 = vmul.f32 1.442695, %v771_v37  ;;  %v892_v48 = vmul.f32 %v1384_v57, %v891_v35  ;;  %v62_v28 = vld [vmem:[%s2246_s1 + $0x70] sm:$0xff]  ;;  %v686_v32 = vld [vmem:[%s2247_s3 + $0x40] sm:$0xff] }
  0x30   :  { %v770_v53 = vsub.f32 0.0, %v754_v44  ;;  %v757_v50 = vand.u32 2147483647, %v1299_v40  ;;  %v735_v58 = vsub.f32 %v703_v34, %v719_v39  ;;  %vm1487_vm9 = vcmp.lt.f32.partialorder %v893_v42, 0.0004427343  ;;  %v672_v42 = vld [vmem:[%s2245_s2 + $0x50] sm:$0xff] }
  0x31   :  { %988 = vst.msk [vmem:[%s2248_s12 + $0x30] sm:$0xff] %vm389_vm2, %v972_v17  ;;  %1072 = vpow2.f32 %v800_v43  ;;  %v702_v57 = vmax.f32 %v1247_v55, 0.0  ;;  %v882_v61 = vadd.f32 1.0, %v881_v52  ;;  %v718_v0 = vmul.f32 %v670_v49, %v1247_v55  ;;  %v675_v52 = vld [vmem:[%s2245_s2 + $0x68] sm:$0xff] }
  0x32   :  { %232 = vperm.xlu1 %1027, %v57_v41   ;;  %227 = vperm.xlu0 %1026, %v56_v38   ;;  %v1477_v46 = vpop.eup %1064  ;;  %v798_v62 = vmul.f32 1.442695, %v770_v53  ;;  %v773_v63 = vsub.f32 0.0, %v757_v50  ;;  %v884_v6 = vand.u32 2147483647, %v1438_v26  ;;  %v705_v24 = vmax.f32 %v1262_v5, 0.0 }
  0x33   :  { %v1067_v56 = vpop.eup %1066  ;;  %v905_v59 = vadd.f32 1.0, %v1477_v46  ;;  %v756_v7 = vand.u32 2147483647, %v1308_v47  ;;  %v908_v4 = vmul.f32 -0.5, %v1477_v46  ;;  %v883_v14 = vmul.f32 %v1438_v26, %v882_v61  ;;  %v674_v50 = vld [vmem:[%s2245_s2 + $0x60] sm:$0xff] }
  0x34   :  { %v889_v60 = vmul.f32 0.6931472, %v1067_v56  ;;  %v804_v55 = vmul.f32 1.442695, %v773_v63  ;;  %v734_v19 = vsub.f32 %v702_v57, %v718_v0  ;;  %vm1512_vm10 = vcmp.lt.f32.partialorder %v884_v6, 0.0004427343 }
  0x35   :  { %1074 = vlog2.f32 %v905_v59  ;;  %v772_v13 = vsub.f32 0.0, %v756_v7  ;;  %v909_v26 = vadd.f32 1.0, %v908_v4  ;;  %v721_v29 = vmul.f32 %v673_v15, %v1262_v5  ;;  %v688_v15 = vld [vmem:[%s2247_s3 + $0x50] sm:$0xff] }
  0x36   :  { %242 = vperm.xlu1 %1027, %v59_v45   ;;  %237 = vperm.xlu0 %1026, %v58_v54   ;;  %v895_v1 = vsel %vm1487_vm9, %v892_v48, %v889_v60  ;;  %1076 = vpow2.f32 %v798_v62  ;;  %v911_v25 = vand.u32 2147483647, %v1477_v46  ;;  %v704_v49 = vmax.f32 %v1267_v9, 0.0 }
  0x37   :  { %v959_v3 = vadd.f32 %v895_v1, %v735_v58  ;;  %1078 = vpow2.f32 %v804_v55  ;;  %v802_v12 = vmul.f32 1.442695, %v772_v13  ;;  %v910_v34 = vmul.f32 %v1477_v46, %v909_v26  ;;  %v689_v46 = vld [vmem:[%s2247_s3 + $0x58] sm:$0xff] }
  0x38   :  { %v1069_v51 = vpop.eup %1068  ;;  %v737_v38 = vsub.f32 %v705_v24, %v721_v29  ;;  %vm912_vm11 = vcmp.lt.f32.partialorder %v911_v25, 0.0004427343  ;;  %v720_v56 = vmul.f32 %v672_v42, %v1267_v9  ;;  %v707_v2 = vmax.f32 %v1280_v18, 0.0  ;;  %v676_v24 = vld [vmem:[%s2245_s2 + $0x70] sm:$0xff] }
  0x39   :  { %v975_v11 = vmul.f32 %v959_v3, %v687_v36  ;;  %v1071_v22 = vpop.eup %1070  ;;  %v880_v23 = vmul.f32 0.6931472, %v1069_v51  ;;  %1080 = vpow2.f32 %v802_v12  ;;  %v723_v57 = vmul.f32 %v675_v52, %v1280_v18  ;;  %v677_v3 = vld [vmem:[%s2245_s2 + $0x78] sm:$0xff] }
  0x3a   :  { %252 = vperm.xlu1 %1027, %v61_v8   ;;  %247 = vperm.xlu0 %1026, %v60_v10   ;;  %v896_v30 = vadd.f32 1.0, %v1071_v22  ;;  %v899_v35 = vmul.f32 -0.5, %v1071_v22  ;;  %v902_v58 = vand.u32 2147483647, %v1071_v22  ;;  %v706_v0 = vmax.f32 %v1290_v27, 0.0 }
  0x3b   :  { %991 = vst.msk [vmem:[%s2248_s12 + $0x48] sm:$0xff] %vm389_vm2, %v975_v11  ;;  %v1073_v16 = vpop.eup %1072  ;;  %v886_v33 = vsel %vm1512_vm10, %v883_v14, %v880_v23  ;;  %v722_v6 = vmul.f32 %v674_v50, %v1290_v27  ;;  %v736_v18 = vsub.f32 %v704_v49, %v720_v56  ;;  %v739_v11 = vsub.f32 %v707_v2, %v723_v57 }
  0x3c   :  { %v958_v41 = vadd.f32 %v886_v33, %v734_v19  ;;  %1082 = vlog2.f32 %v896_v30  ;;  %v923_v5 = vadd.f32 1.0, %v1073_v16  ;;  %v926_v43 = vmul.f32 -0.5, %v1073_v16 }
  0x3d   :  { %v900_v53 = vadd.f32 1.0, %v899_v35  ;;  %v929_v8 = vand.u32 2147483647, %v1073_v16  ;;  %vm903_vm12 = vcmp.lt.f32.partialorder %v902_v58, 0.0004427343  ;;  %v738_v20 = vsub.f32 %v706_v0, %v722_v6 }
  0x3e   :  { %262 = vperm.xlu1 %1027, %v63_v21   ;;  %257 = vperm.xlu0 %1026, %v62_v28   ;;  %v974_v37 = vmul.f32 %v958_v41, %v686_v32  ;;  %1084 = vlog2.f32 %v923_v5  ;;  %v927_v63 = vadd.f32 1.0, %v926_v43  ;;  %v725_v28 = vmul.f32 %v677_v3, %v1299_v40  ;;  %v691_v32 = vld [vmem:[%s2247_s3 + $0x68] sm:$0xff]  ;;  %v1634_v6 = vld [vmem:[%s2250_s6] ss:$0 sm:$0xff] }
  0x3f   :  { %v1075_v31 = vpop.eup %1074  ;;  %v901_v7 = vmul.f32 %v1071_v22, %v900_v53  ;;  %vm1576_vm13 = vcmp.lt.f32.partialorder %v929_v8, 0.0004427343  ;;  %v709_v22 = vmax.f32 %v1299_v40, 0.0  ;;  %v708_v25 = vmax.f32 %v1308_v47, 0.0 }
  0x40   :  { %v1535_v17 = vpop.eup %1076  ;;  %v907_v39 = vmul.f32 0.6931472, %v1075_v31  ;;  %990 = vst.msk [vmem:[%s2248_s12 + $0x40] sm:$0xff] %vm389_vm2, %v974_v37  ;;  %v928_v10 = vmul.f32 %v1073_v16, %v927_v63  ;;  %v724_v5 = vmul.f32 %v676_v24, %v1308_v47 }
  0x41   :  { %v914_v44 = vadd.f32 1.0, %v1535_v17  ;;  %v1548_v45 = vpop.eup %1078  ;;  %v917_v59 = vmul.f32 -0.5, %v1535_v17  ;;  %v920_v27 = vand.u32 2147483647, %v1535_v17  ;;  %v741_v42 = vsub.f32 %v709_v22, %v725_v28 }
  0x42   :  { %v913_v48 = vsel %vm912_vm11, %v910_v34, %v907_v39  ;;  %v941_v60 = vadd.f32 1.0, %v1548_v45  ;;  %v944_v1 = vmul.f32 -0.5, %v1548_v45  ;;  %v947_v29 = vand.u32 2147483647, %v1548_v45 }
  0x43   :  { %v961_v54 = vadd.f32 %v913_v48, %v737_v38  ;;  %1086 = vlog2.f32 %v914_v44  ;;  %v1081_v61 = vpop.eup %1080  ;;  %v918_v55 = vadd.f32 1.0, %v917_v59  ;;  %vm921_vm14 = vcmp.lt.f32.partialorder %v920_v27, 0.0004427343  ;;  %v693_v48 = vld [vmem:[%s2247_s3 + $0x78] sm:$0xff]  ;;  %v1627_v59 = vld [vmem:[%s2249_s4] ss:$0 sm:$0xff] }
  0x44   :  { %1088 = vlog2.f32 %v941_v60  ;;  %v932_v9 = vadd.f32 1.0, %v1081_v61  ;;  %v935_v13 = vmul.f32 -0.5, %v1081_v61  ;;  %v945_v23 = vadd.f32 1.0, %v944_v1 }
  0x45   :  { %v977_v62 = vmul.f32 %v961_v54, %v689_v46  ;;  %v919_v26 = vmul.f32 %v1535_v17, %v918_v55  ;;  %v938_v40 = vand.u32 2147483647, %v1081_v61  ;;  %v690_v17 = vld [vmem:[%s2247_s3 + $0x60] sm:$0xff]  ;;  %vm948_vm15 = vcmp.lt.f32.partialorder %v947_v29, 0.0004427343  ;;  %v692_v54 = vld [vmem:[%s2247_s3 + $0x70] sm:$0xff] }
  0x46   :  { %v1083_v36 = vpop.eup %1082  ;;  %1090 = vlog2.f32 %v932_v9  ;;  %v936_v41 = vadd.f32 1.0, %v935_v13  ;;  %v946_v31 = vmul.f32 %v1548_v45, %v945_v23  ;;  %v740_v46 = vsub.f32 %v708_v25, %v724_v5 }
  0x47   :  { %993 = vst.msk [vmem:[%s2248_s12 + $0x58] sm:$0xff] %vm389_vm2, %v977_v62  ;;  %v898_v4 = vmul.f32 0.6931472, %v1083_v36  ;;  %vm939_vm0 = vcmp.lt.f32.partialorder %v938_v40, 0.0004427343 }
  0x48   :  { %v1085_v14 = vpop.eup %1084  ;;  %v937_v47 = vmul.f32 %v1081_v61, %v936_v41 }
  0x49   :  { %v904_v51 = vsel %vm903_vm12, %v901_v7, %v898_v4  ;;  %v925_v21 = vmul.f32 0.6931472, %v1085_v14 }
  0x4a   :  { %v960_v12 = vadd.f32 %v904_v51, %v736_v18 }
  0x4b   :  { %v931_v33 = vsel %vm1576_vm13, %v928_v10, %v925_v21 }
  0x4c   :  { %v976_v16 = vmul.f32 %v960_v12, %v688_v15  ;;  %v963_v34 = vadd.f32 %v931_v33, %v739_v11 }
  0x4d   :  { %v1087_v30 = vpop.eup %1086 }
  0x4e   :  { %v916_v35 = vmul.f32 0.6931472, %v1087_v30  ;;  %992 = vst.msk [vmem:[%s2248_s12 + $0x50] sm:$0xff] %vm389_vm2, %v976_v16  ;;  %v1089_v37 = vpop.eup %1088  ;;  %v979_v38 = vmul.f32 %v963_v34, %v691_v32 }
  0x4f   :  { %v943_v43 = vmul.f32 0.6931472, %v1089_v37 }
  0x50   :  { %v922_v39 = vsel %vm921_vm14, %v919_v26, %v916_v35  ;;  %v1091_v44 = vpop.eup %1090  ;;  %995 = vst.msk [vmem:[%s2248_s12 + $0x68] sm:$0xff] %vm389_vm2, %v979_v38 }
  0x51   :  { %v962_v52 = vadd.f32 %v922_v39, %v738_v20  ;;  %v949_v49 = vsel %vm948_vm15, %v946_v31, %v943_v43  ;;  %v934_v53 = vmul.f32 0.6931472, %v1091_v44 }
  0x52   :  { %v965_v50 = vadd.f32 %v949_v49, %v741_v42 }
  0x53   :  { %v978_v45 = vmul.f32 %v962_v52, %v690_v17  ;;  %v940_v56 = vsel %vm939_vm0, %v937_v47, %v934_v53 }
  0x54   :  { %v981_v58 = vmul.f32 %v965_v50, %v693_v48  ;;  %v964_v2 = vadd.f32 %v940_v56, %v740_v46 }
  0x55   :  { %994 = vst.msk [vmem:[%s2248_s12 + $0x60] sm:$0xff] %vm389_vm2, %v978_v45 }
  0x56   :  { %997 = vst.msk [vmem:[%s2248_s12 + $0x78] sm:$0xff] %vm389_vm2, %v981_v58  ;;  %v980_v57 = vmul.f32 %v964_v2, %v692_v54 }
  0x58   :  { %996 = vst.msk [vmem:[%s2248_s12 + $0x70] sm:$0xff] %vm389_vm2, %v980_v57 }
  0x81   :  { %v80_v60 = vpop.permute.xlu1 %79  ;;  %v70_v62 = vpop.permute.xlu0 %69 }
  0x82   :  { %v155_v61 = vsub.f32 %v80_v60, %v1627_v59  ;;  %v153_v63 = vsub.f32 %v70_v62, %v1627_v59 }
  0x84   :  { %v171_v0 = vand.u32 2147483647, %v155_v61  ;;  %v169_v7 = vand.u32 2147483647, %v153_v63 }
  0x85   :  { %v85_v8 = vpop.permute.xlu1 %84  ;;  %v75_v36 = vpop.permute.xlu0 %74 }
  0x86   :  { %v156_v9 = vsub.f32 %v85_v8, %v1627_v59  ;;  %v1638_v18 = vmul.f32 %v1634_v6, %v171_v0  ;;  %v154_v1 = vsub.f32 %v75_v36, %v1627_v59  ;;  %v1642_v4 = vmul.f32 %v1634_v6, %v169_v7 }
  0x88   :  { %v172_v55 = vand.u32 2147483647, %v156_v9  ;;  %v1645_v10 = vmul.f32 %v1638_v18, %v171_v0  ;;  %v170_v27 = vand.u32 2147483647, %v154_v1  ;;  %341 = vadd.xlane.f32.xlu0 %v1642_v4  ;;  %v1649_v13 = vmul.f32 %v1642_v4, %v169_v7 }
  0x89   :  { %v95_v3 = vpop.permute.xlu1 %94  ;;  %v90_v15 = vpop.permute.xlu0 %89 }
  0x8a   :  { %v158_v14 = vsub.f32 %v95_v3, %v1627_v59  ;;  %v1653_v51 = vmul.f32 %v1634_v6, %v172_v55  ;;  %v157_v11 = vsub.f32 %v90_v15, %v1627_v59  ;;  %v1657_v19 = vmul.f32 %v1634_v6, %v170_v27 }
  0x8c   :  { %v174_v20 = vand.u32 2147483647, %v158_v14  ;;  %v1660_v12 = vmul.f32 %v1653_v51, %v172_v55  ;;  %v173_v21 = vand.u32 2147483647, %v157_v11  ;;  %345 = vadd.xlane.f32.xlu0 %v1638_v18  ;;  %343 = vadd.xlane.f32.xlu1 %v1657_v19  ;;  %v1665_v23 = vmul.f32 %v1657_v19, %v170_v27  ;;  %v1742_v55 = vld [vmem:[%s2251_s5] ss:$0 sm:$0xff] }
  0x8d   :  { %v105_v22 = vpop.permute.xlu1 %104  ;;  %v100_v26 = vpop.permute.xlu0 %99 }
  0x8e   :  { %v160_v24 = vsub.f32 %v105_v22, %v1627_v59  ;;  %v1669_v28 = vmul.f32 %v1634_v6, %v174_v20  ;;  %v159_v29 = vsub.f32 %v100_v26, %v1627_v59  ;;  %v1673_v25 = vmul.f32 %v1634_v6, %v173_v21 }
  0x90   :  { %v176_v30 = vand.u32 2147483647, %v160_v24  ;;  %v1676_v16 = vmul.f32 %v1669_v28, %v174_v20  ;;  %v175_v32 = vand.u32 2147483647, %v159_v29  ;;  %347 = vadd.xlane.f32.xlu0 %v1653_v51  ;;  %349 = vadd.xlane.f32.xlu1 %v1673_v25  ;;  %v1681_v41 = vmul.f32 %v1673_v25, %v173_v21 }
  0x91   :  { %v115_v33 = vpop.permute.xlu1 %114  ;;  %v110_v35 = vpop.permute.xlu0 %109 }
  0x92   :  { %v162_v34 = vsub.f32 %v115_v33, %v1627_v59  ;;  %v1685_v5 = vmul.f32 %v1634_v6, %v176_v30  ;;  %v161_v40 = vsub.f32 %v110_v35, %v1627_v59  ;;  %v1689_v31 = vmul.f32 %v1634_v6, %v175_v32 }
  0x94   :  { %v178_v37 = vand.u32 2147483647, %v162_v34  ;;  %v1692_v38 = vmul.f32 %v1685_v5, %v176_v30  ;;  %v177_v17 = vand.u32 2147483647, %v161_v40  ;;  %351 = vadd.xlane.f32.xlu0 %v1669_v28  ;;  %353 = vadd.xlane.f32.xlu1 %v1689_v31  ;;  %v1697_v42 = vmul.f32 %v1689_v31, %v175_v32 }
  0x95   :  { %v125_v39 = vpop.permute.xlu1 %124  ;;  %v120_v43 = vpop.permute.xlu0 %119 }
  0x96   :  { %v164_v52 = vsub.f32 %v125_v39, %v1627_v59  ;;  %v1701_v47 = vmul.f32 %v1634_v6, %v178_v37  ;;  %v163_v44 = vsub.f32 %v120_v43, %v1627_v59  ;;  %v1705_v46 = vmul.f32 %v1634_v6, %v177_v17 }
  0x98   :  { %v180_v45 = vand.u32 2147483647, %v164_v52  ;;  %v1708_v48 = vmul.f32 %v1701_v47, %v178_v37  ;;  %v179_v49 = vand.u32 2147483647, %v163_v44  ;;  %355 = vadd.xlane.f32.xlu0 %v1685_v5  ;;  %357 = vadd.xlane.f32.xlu1 %v1705_v46  ;;  %v1713_v50 = vmul.f32 %v1705_v46, %v177_v17 }
  0x99   :  { %v135_v53 = vpop.permute.xlu1 %134  ;;  %v130_v56 = vpop.permute.xlu0 %129 }
  0x9a   :  { %v166_v54 = vsub.f32 %v135_v53, %v1627_v59  ;;  %v1717_v58 = vmul.f32 %v1634_v6, %v180_v45  ;;  %v165_v2 = vsub.f32 %v130_v56, %v1627_v59  ;;  %v1721_v57 = vmul.f32 %v1634_v6, %v179_v49 }
  0x9c   :  { %v182_v60 = vand.u32 2147483647, %v166_v54  ;;  %v1724_v61 = vmul.f32 %v1717_v58, %v180_v45  ;;  %v181_v62 = vand.u32 2147483647, %v165_v2  ;;  %359 = vadd.xlane.f32.xlu0 %v1701_v47  ;;  %361 = vadd.xlane.f32.xlu1 %v1721_v57  ;;  %v1729_v0 = vmul.f32 %v1721_v57, %v179_v49 }
  0x9d   :  { %v145_v63 = vpop.permute.xlu1 %144  ;;  %v140_v9 = vpop.permute.xlu0 %139 }
  0x9e   :  { %v1732_v7 = vmul.f32 %v1634_v6, %v182_v60  ;;  %v168_v8 = vsub.f32 %v145_v63, %v1627_v59  ;;  %v167_v36 = vsub.f32 %v140_v9, %v1627_v59  ;;  %v1737_v1 = vmul.f32 %v1634_v6, %v181_v62 }
  0xa0   :  { %v184_v27 = vand.u32 2147483647, %v168_v8  ;;  %v1745_v3 = vmul.f32 %v1732_v7, %v182_v60  ;;  %v183_v14 = vand.u32 2147483647, %v167_v36  ;;  %363 = vadd.xlane.f32.xlu0 %v1717_v58  ;;  %365 = vadd.xlane.f32.xlu1 %v1737_v1  ;;  %v1750_v59 = vmul.f32 %v1737_v1, %v181_v62 }
  0xa1   :  { %v193_v15 = vpop.permute.xlu1 %192  ;;  %v188_v21 = vpop.permute.xlu0 %187 }
  0xa2   :  { %v1753_v11 = vmul.f32 %v1634_v6, %v184_v27  ;;  %v272_v20 = vsub.f32 %v193_v15, %v1742_v55  ;;  %v271_v22 = vsub.f32 %v188_v21, %v1742_v55  ;;  %v1758_v24 = vmul.f32 %v1634_v6, %v183_v14 }
  0xa4   :  { %v1760_v26 = vand.u32 2147483647, %v272_v20  ;;  %v1763_v29 = vmul.f32 %v1753_v11, %v184_v27  ;;  %v1765_v30 = vand.u32 2147483647, %v271_v22  ;;  %367 = vadd.xlane.f32.xlu0 %v1732_v7  ;;  %369 = vadd.xlane.f32.xlu1 %v1758_v24  ;;  %v1770_v33 = vmul.f32 %v1758_v24, %v183_v14 }
  0xa5   :  { %v203_v32 = vpop.permute.xlu1 %202  ;;  %v198_v35 = vpop.permute.xlu0 %197 }
  0xa6   :  { %v274_v34 = vsub.f32 %v203_v32, %v1742_v55  ;;  %v326_v40 = vmul.f32 %v1634_v6, %v1760_v26  ;;  %v273_v37 = vsub.f32 %v198_v35, %v1742_v55  ;;  %v325_v17 = vmul.f32 %v1634_v6, %v1765_v30 }
  0xa8   :  { %v1778_v39 = vand.u32 2147483647, %v274_v34  ;;  %v1781_v52 = vmul.f32 %v326_v40, %v1760_v26  ;;  %v1783_v43 = vand.u32 2147483647, %v273_v37  ;;  %371 = vadd.xlane.f32.xlu0 %v1753_v11  ;;  %406 = vadd.xlane.f32.xlu1 %v325_v17  ;;  %v1787_v45 = vmul.f32 %v325_v17, %v1765_v30 }
  0xa9   :  { %v213_v44 = vpop.permute.xlu1 %212  ;;  %v208_v53 = vpop.permute.xlu0 %207 }
  0xaa   :  { %2279 = vst [vmem:[#allocation2_spill] sm:$0xff] %v1781_v52  ;;  %v276_v49 = vsub.f32 %v213_v44, %v1742_v55  ;;  %v328_v54 = vmul.f32 %v1634_v6, %v1778_v39  ;;  %v275_v56 = vsub.f32 %v208_v53, %v1742_v55  ;;  %v327_v2 = vmul.f32 %v1634_v6, %v1783_v43 }
  0xac   :  { %v1795_v60 = vand.u32 2147483647, %v276_v49  ;;  %v1798_v62 = vmul.f32 %v328_v54, %v1778_v39  ;;  %v1800_v63 = vand.u32 2147483647, %v275_v56  ;;  %408 = vadd.xlane.f32.xlu0 %v326_v40  ;;  %410 = vadd.xlane.f32.xlu1 %v327_v2  ;;  %v1803_v9 = vmul.f32 %v327_v2, %v1783_v43 }
  0xad   :  { %v223_v8 = vpop.permute.xlu1 %222  ;;  %v218_v27 = vpop.permute.xlu0 %217 }
  0xae   :  { %2280 = vst [vmem:[#allocation3_spill] sm:$0xff] %v1798_v62  ;;  %2281 = vst [vmem:[#allocation4_spill] sm:$0xff] %v1803_v9  ;;  %v278_v36 = vsub.f32 %v223_v8, %v1742_v55  ;;  %v330_v14 = vmul.f32 %v1634_v6, %v1795_v60  ;;  %v277_v15 = vsub.f32 %v218_v27, %v1742_v55 }
  0xaf   :  { %v329_v20 = vmul.f32 %v1634_v6, %v1800_v63 }
  0xb0   :  { %v1811_v21 = vand.u32 2147483647, %v278_v36  ;;  %v1814_v22 = vmul.f32 %v330_v14, %v1795_v60  ;;  %v1816_v32 = vand.u32 2147483647, %v277_v15  ;;  %412 = vadd.xlane.f32.xlu0 %v328_v54 }
  0xb1   :  { %414 = vadd.xlane.f32.xlu1 %v329_v20  ;;  %v1819_v34 = vmul.f32 %v329_v20, %v1800_v63  ;;  %v233_v35 = vpop.permute.xlu1 %232  ;;  %v228_v37 = vpop.permute.xlu0 %227 }
  0xb2   :  { %2282 = vst [vmem:[#allocation5_spill] sm:$0xff] %v1814_v22  ;;  %v280_v40 = vsub.f32 %v233_v35, %v1742_v55  ;;  %v332_v17 = vmul.f32 %v1634_v6, %v1811_v21  ;;  %v279_v44 = vsub.f32 %v228_v37, %v1742_v55  ;;  %v331_v49 = vmul.f32 %v1634_v6, %v1816_v32 }
  0xb3   :  { %2283 = vst [vmem:[#allocation6_spill] sm:$0xff] %v1819_v34 }
  0xb4   :  { %v1827_v53 = vand.u32 2147483647, %v280_v40  ;;  %v1830_v54 = vmul.f32 %v332_v17, %v1811_v21  ;;  %v295_v56 = vand.u32 2147483647, %v279_v44  ;;  %416 = vadd.xlane.f32.xlu0 %v330_v14  ;;  %v1833_v2 = vmul.f32 %v331_v49, %v1816_v32 }
  0xb5   :  { %418 = vadd.xlane.f32.xlu1 %v331_v49  ;;  %v243_v8 = vpop.permute.xlu1 %242  ;;  %v238_v27 = vpop.permute.xlu0 %237 }
  0xb6   :  { %2284 = vst [vmem:[#allocation7_spill] sm:$0xff] %v1830_v54  ;;  %2285 = vst [vmem:[#allocation8_spill] sm:$0xff] %v1833_v2  ;;  %v282_v36 = vsub.f32 %v243_v8, %v1742_v55  ;;  %v334_v15 = vmul.f32 %v1634_v6, %v1827_v53  ;;  %v281_v20 = vsub.f32 %v238_v27, %v1742_v55 }
  0xb7   :  { %v333_v35 = vmul.f32 %v1634_v6, %v295_v56 }
  0xb8   :  { %v298_v40 = vand.u32 2147483647, %v282_v36  ;;  %v1841_v37 = vmul.f32 %v334_v15, %v1827_v53  ;;  %v297_v14 = vand.u32 2147483647, %v281_v20  ;;  %420 = vadd.xlane.f32.xlu0 %v332_v17 }
  0xb9   :  { %422 = vadd.xlane.f32.xlu1 %v333_v35  ;;  %v1843_v44 = vmul.f32 %v333_v35, %v295_v56  ;;  %v253_v49 = vpop.permute.xlu1 %252  ;;  %v248_v54 = vpop.permute.xlu0 %247 }
  0xba   :  { %2286 = vst [vmem:[#allocation9_spill] sm:$0xff] %v1841_v37  ;;  %v284_v8 = vsub.f32 %v253_v49, %v1742_v55  ;;  %v336_v2 = vmul.f32 %v1634_v6, %v298_v40  ;;  %v283_v22 = vsub.f32 %v248_v54, %v1742_v55  ;;  %v335_v27 = vmul.f32 %v1634_v6, %v297_v14 }
  0xbb   :  { %2287 = vst [vmem:[#allocation10_spill] sm:$0xff] %v1843_v44 }
  0xbc   :  { %v300_v34 = vand.u32 2147483647, %v284_v8  ;;  %v1849_v36 = vmul.f32 %v336_v2, %v298_v40  ;;  %v299_v62 = vand.u32 2147483647, %v283_v22  ;;  %424 = vadd.xlane.f32.xlu0 %v334_v15  ;;  %v1851_v17 = vmul.f32 %v335_v27, %v297_v14 }
  0xbd   :  { %426 = vadd.xlane.f32.xlu1 %v335_v27  ;;  %v263_v20 = vpop.permute.xlu1 %262  ;;  %v258_v37 = vpop.permute.xlu0 %257 }
  0xbe   :  { %2288 = vst [vmem:[#allocation11_spill] sm:$0xff] %v1849_v36  ;;  %v286_v35 = vsub.f32 %v263_v20, %v1742_v55  ;;  %v338_v49 = vmul.f32 %v1634_v6, %v300_v34  ;;  %v285_v44 = vsub.f32 %v258_v37, %v1742_v55  ;;  %v337_v54 = vmul.f32 %v1634_v6, %v299_v62 }
  0xbf   :  { %v470_v55 = vmul.f32 %v1642_v4, %v1765_v30  ;;  %v472_v37 = vmul.f32 %v1638_v18, %v1783_v43  ;;  %v475_v4 = vmul.f32 %v1669_v28, %v1795_v60  ;;  %v476_v30 = vmul.f32 %v1689_v31, %v1816_v32 }
  0xc0   :  { %v302_v9 = vand.u32 2147483647, %v286_v35  ;;  %v1857_v52 = vmul.f32 %v338_v49, %v300_v34  ;;  %v301_v8 = vand.u32 2147483647, %v285_v44  ;;  %428 = vadd.xlane.f32.xlu0 %v336_v2  ;;  %v1859_v22 = vmul.f32 %v337_v54, %v299_v62 }
  0xc1   :  { %430 = vadd.xlane.f32.xlu1 %v337_v54  ;;  %v471_v2 = vmul.f32 %v1657_v19, %v1760_v26  ;;  %v474_v44 = vmul.f32 %v1673_v25, %v1800_v63  ;;  %v477_v18 = vmul.f32 %v1685_v5, %v1811_v21  ;;  %v478_v19 = vmul.f32 %v1705_v46, %v295_v56 }
  0xc2   :  { %v340_v15 = vmul.f32 %v1634_v6, %v302_v9  ;;  %v339_v27 = vmul.f32 %v1634_v6, %v301_v8  ;;  %v473_v6 = vmul.f32 %v1653_v51, %v1778_v39  ;;  %v479_v51 = vmul.f32 %v1701_v47, %v1827_v53  ;;  %v2295_v47 = vld [vmem:[#allocation7_spill] sm:$0xff] }
  0xc3   :  { %v480_v25 = vmul.f32 %v1721_v57, %v297_v14  ;;  %v481_v28 = vmul.f32 %v1717_v58, %v298_v40  ;;  %v482_v31 = vmul.f32 %v1737_v1, %v299_v62  ;;  %v483_v26 = vmul.f32 %v1732_v7, %v300_v34 }
  0xc4   :  { %v1863_v20 = vmul.f32 %v340_v15, %v302_v9  ;;  %432 = vadd.xlane.f32.xlu0 %v338_v49  ;;  %v1865_v36 = vmul.f32 %v339_v27, %v301_v8  ;;  %v484_v5 = vmul.f32 %v1758_v24, %v301_v8  ;;  %v485_v46 = vmul.f32 %v1753_v11, %v302_v9 }
  0xc5   :  { %434 = vadd.xlane.f32.xlu1 %v339_v27  ;;  %v2298_v11 = vld [vmem:[#allocation11_spill] sm:$0xff] }
  0xc8   :  { %436 = vadd.xlane.f32.xlu0 %v340_v15 }
  0xc9   :  { %486 = vadd.xlane.f32.xlu1 %v470_v55 }
  0xcc   :  { %488 = vadd.xlane.f32.xlu0 %v471_v2 }
  0xcd   :  { %490 = vadd.xlane.f32.xlu1 %v472_v37 }
  0xd0   :  { %492 = vadd.xlane.f32.xlu0 %v473_v6 }
  0xd1   :  { %494 = vadd.xlane.f32.xlu1 %v474_v44 }
  0xd4   :  { %496 = vadd.xlane.f32.xlu0 %v475_v4 }
  0xd5   :  { %498 = vadd.xlane.f32.xlu1 %v476_v30 }
  0xd8   :  { %500 = vadd.xlane.f32.xlu0 %v477_v18 }
  0xd9   :  { %502 = vadd.xlane.f32.xlu1 %v478_v19 }
  0xdc   :  { %504 = vadd.xlane.f32.xlu0 %v479_v51 }
  0xdd   :  { %506 = vadd.xlane.f32.xlu1 %v480_v25 }
  0xe0   :  { %508 = vadd.xlane.f32.xlu0 %v481_v28 }
  0xe1   :  { %510 = vadd.xlane.f32.xlu1 %v482_v31 }
  0xe4   :  { %512 = vadd.xlane.f32.xlu0 %v483_v26 }
  0xe5   :  { %514 = vadd.xlane.f32.xlu1 %v484_v5 }
  0xe8   :  { %516 = vadd.xlane.f32.xlu0 %v485_v46 }
  0xe9   :  { %550 = vadd.xlane.f32.xlu1 %v1649_v13  ;;  %v2290_v13 = vld [vmem:[#allocation4_spill] sm:$0xff] }
  0xec   :  { %552 = vadd.xlane.f32.xlu0 %v1665_v23  ;;  %v2292_v23 = vld [vmem:[#allocation6_spill] sm:$0xff] }
  0xed   :  { %554 = vadd.xlane.f32.xlu1 %v1645_v10  ;;  %v2289_v10 = vld [vmem:[#allocation2_spill] sm:$0xff] }
  0xf0   :  { %556 = vadd.xlane.f32.xlu0 %v1660_v12  ;;  %v2291_v12 = vld [vmem:[#allocation3_spill] sm:$0xff] }
  0xf1   :  { %558 = vadd.xlane.f32.xlu1 %v1681_v41  ;;  %v2294_v41 = vld [vmem:[#allocation8_spill] sm:$0xff] }
  0xf4   :  { %560 = vadd.xlane.f32.xlu0 %v1676_v16  ;;  %v2293_v16 = vld [vmem:[#allocation5_spill] sm:$0xff] }
  0xf5   :  { %562 = vadd.xlane.f32.xlu1 %v1697_v42 }
  0xf8   :  { %564 = vadd.xlane.f32.xlu0 %v1692_v38 }
  0xf9   :  { %566 = vadd.xlane.f32.xlu1 %v1713_v50 }
  0xfc   :  { %568 = vadd.xlane.f32.xlu0 %v1708_v48  ;;  %v2296_v48 = vld [vmem:[#allocation10_spill] sm:$0xff] }
  0xfd   :  { %570 = vadd.xlane.f32.xlu1 %v1729_v0  ;;  %v2297_v0 = vld [vmem:[#allocation9_spill] sm:$0xff] }
 0x100   :  { %572 = vadd.xlane.f32.xlu0 %v1724_v61 }
 0x101   :  { %574 = vadd.xlane.f32.xlu1 %v1750_v59 }
 0x104   :  { %576 = vadd.xlane.f32.xlu0 %v1745_v3 }
 0x105   :  { %578 = vadd.xlane.f32.xlu1 %v1770_v33 }
 0x108   :  { %580 = vadd.xlane.f32.xlu0 %v1763_v29 }
 0x109   :  { %614 = vadd.xlane.f32.xlu1 %v1787_v45 }
 0x10c   :  { %616 = vadd.xlane.f32.xlu0 %v2289_v10 }
 0x10d   :  { %618 = vadd.xlane.f32.xlu1 %v2290_v13 }
 0x110   :  { %620 = vadd.xlane.f32.xlu0 %v2291_v12 }
 0x111   :  { %622 = vadd.xlane.f32.xlu1 %v2292_v23 }
 0x114   :  { %624 = vadd.xlane.f32.xlu0 %v2293_v16 }
 0x115   :  { %626 = vadd.xlane.f32.xlu1 %v2294_v41  ;;  %v342_v38 = vpop.xlane.xlu0 %341 }
 0x116   :  { %v373_v42 = vmul.f32 0.015625, %v342_v38 }
 0x118   :  { %390 = vst.msk [vmem:[%s2252_s7] sm:$0xff] %vm389_vm2, %v373_v42  ;;  %628 = vadd.xlane.f32.xlu0 %v2295_v47 }
 0x119   :  { %630 = vadd.xlane.f32.xlu1 %v2296_v48  ;;  %v344_v50 = vpop.xlane.xlu1 %343  ;;  %v346_v58 = vpop.xlane.xlu0 %345 }
 0x11a   :  { %v374_v57 = vmul.f32 0.015625, %v344_v50  ;;  %v375_v61 = vmul.f32 0.015625, %v346_v58 }
 0x11c   :  { %391 = vst.msk [vmem:[%s2252_s7 + $0x8] sm:$0xff] %vm389_vm2, %v374_v57  ;;  %392 = vst.msk [vmem:[%s2252_s7 + $0x10] sm:$0xff] %vm389_vm2, %v375_v61  ;;  %632 = vadd.xlane.f32.xlu0 %v2297_v0 }
 0x11d   :  { %634 = vadd.xlane.f32.xlu1 %v1851_v17  ;;  %v350_v7 = vpop.xlane.xlu1 %349  ;;  %v348_v1 = vpop.xlane.xlu0 %347 }
 0x11e   :  { %v377_v3 = vmul.f32 0.015625, %v350_v7  ;;  %v376_v59 = vmul.f32 0.015625, %v348_v1 }
 0x120   :  { %394 = vst.msk [vmem:[%s2252_s7 + $0x20] sm:$0xff] %vm389_vm2, %v377_v3  ;;  %393 = vst.msk [vmem:[%s2252_s7 + $0x18] sm:$0xff] %vm389_vm2, %v376_v59  ;;  %636 = vadd.xlane.f32.xlu0 %v2298_v11 }
 0x121   :  { %638 = vadd.xlane.f32.xlu1 %v1859_v22  ;;  %v354_v24 = vpop.xlane.xlu1 %353  ;;  %v352_v29 = vpop.xlane.xlu0 %351 }
 0x122   :  { %v379_v33 = vmul.f32 0.015625, %v354_v24  ;;  %v378_v39 = vmul.f32 0.015625, %v352_v29 }
 0x124   :  { %396 = vst.msk [vmem:[%s2252_s7 + $0x30] sm:$0xff] %vm389_vm2, %v379_v33  ;;  %395 = vst.msk [vmem:[%s2252_s7 + $0x28] sm:$0xff] %vm389_vm2, %v378_v39  ;;  %640 = vadd.xlane.f32.xlu0 %v1857_v52 }
 0x125   :  { %642 = vadd.xlane.f32.xlu1 %v1865_v36  ;;  %v358_v43 = vpop.xlane.xlu1 %357  ;;  %v356_v45 = vpop.xlane.xlu0 %355 }
 0x126   :  { %v381_v60 = vmul.f32 0.015625, %v358_v43  ;;  %v380_v62 = vmul.f32 0.015625, %v356_v45 }
 0x128   :  { %398 = vst.msk [vmem:[%s2252_s7 + $0x40] sm:$0xff] %vm389_vm2, %v381_v60  ;;  %397 = vst.msk [vmem:[%s2252_s7 + $0x38] sm:$0xff] %vm389_vm2, %v380_v62  ;;  %644 = vadd.xlane.f32.xlu0 %v1863_v20 }
 0x129   :  { %v362_v63 = vpop.xlane.xlu1 %361  ;;  %v360_v52 = vpop.xlane.xlu0 %359 }
 0x12a   :  { %v383_v9 = vmul.f32 0.015625, %v362_v63  ;;  %v382_v21 = vmul.f32 0.015625, %v360_v52 }
 0x12c   :  { %400 = vst.msk [vmem:[%s2252_s7 + $0x50] sm:$0xff] %vm389_vm2, %v383_v9  ;;  %399 = vst.msk [vmem:[%s2252_s7 + $0x48] sm:$0xff] %vm389_vm2, %v382_v21 }
 0x12d   :  { %v366_v32 = vpop.xlane.xlu1 %365  ;;  %v364_v34 = vpop.xlane.xlu0 %363 }
 0x12e   :  { %v385_v53 = vmul.f32 0.015625, %v366_v32  ;;  %v384_v56 = vmul.f32 0.015625, %v364_v34 }
 0x130   :  { %402 = vst.msk [vmem:[%s2252_s7 + $0x60] sm:$0xff] %vm389_vm2, %v385_v53  ;;  %401 = vst.msk [vmem:[%s2252_s7 + $0x58] sm:$0xff] %vm389_vm2, %v384_v56 }
 0x131   :  { %v370_v40 = vpop.xlane.xlu1 %369  ;;  %v368_v14 = vpop.xlane.xlu0 %367 }
 0x132   :  { %v387_v36 = vmul.f32 0.015625, %v370_v40  ;;  %v386_v17 = vmul.f32 0.015625, %v368_v14 }
 0x134   :  { %404 = vst.msk [vmem:[%s2252_s7 + $0x70] sm:$0xff] %vm389_vm2, %v387_v36  ;;  %403 = vst.msk [vmem:[%s2252_s7 + $0x68] sm:$0xff] %vm389_vm2, %v386_v17 }
 0x135   :  { %v407_v35 = vpop.xlane.xlu1 %406  ;;  %v372_v49 = vpop.xlane.xlu0 %371 }
 0x136   :  { %v438_v54 = vmul.f32 0.015625, %v407_v35  ;;  %v388_v8 = vmul.f32 0.015625, %v372_v49 }
 0x138   :  { %454 = vst.msk [vmem:[%s2253_s8] sm:$0xff] %vm389_vm2, %v438_v54  ;;  %405 = vst.msk [vmem:[%s2252_s7 + $0x78] sm:$0xff] %vm389_vm2, %v388_v8 }
 0x139   :  { %v411_v22 = vpop.xlane.xlu1 %410  ;;  %v409_v15 = vpop.xlane.xlu0 %408 }
 0x13a   :  { %v440_v27 = vmul.f32 0.015625, %v411_v22  ;;  %v439_v20 = vmul.f32 0.015625, %v409_v15 }
 0x13c   :  { %456 = vst.msk [vmem:[%s2253_s8 + $0x10] sm:$0xff] %vm389_vm2, %v440_v27  ;;  %455 = vst.msk [vmem:[%s2253_s8 + $0x8] sm:$0xff] %vm389_vm2, %v439_v20 }
 0x13d   :  { %v413_v2 = vpop.xlane.xlu0 %412 }
 0x13e   :  { %v415_v55 = vpop.xlane.xlu1 %414  ;;  %v441_v6 = vmul.f32 0.015625, %v413_v2 }
 0x13f   :  { %v442_v37 = vmul.f32 0.015625, %v415_v55 }
 0x140   :  { %457 = vst.msk [vmem:[%s2253_s8 + $0x18] sm:$0xff] %vm389_vm2, %v441_v6 }
 0x141   :  { %458 = vst.msk [vmem:[%s2253_s8 + $0x20] sm:$0xff] %vm389_vm2, %v442_v37  ;;  %v417_v4 = vpop.xlane.xlu0 %416 }
 0x142   :  { %v419_v44 = vpop.xlane.xlu1 %418  ;;  %v443_v18 = vmul.f32 0.015625, %v417_v4 }
 0x143   :  { %v444_v30 = vmul.f32 0.015625, %v419_v44 }
 0x144   :  { %459 = vst.msk [vmem:[%s2253_s8 + $0x28] sm:$0xff] %vm389_vm2, %v443_v18 }
 0x145   :  { %460 = vst.msk [vmem:[%s2253_s8 + $0x30] sm:$0xff] %vm389_vm2, %v444_v30  ;;  %v421_v51 = vpop.xlane.xlu0 %420 }
 0x146   :  { %v423_v19 = vpop.xlane.xlu1 %422  ;;  %v445_v28 = vmul.f32 0.015625, %v421_v51 }
 0x147   :  { %v446_v25 = vmul.f32 0.015625, %v423_v19 }
 0x148   :  { %461 = vst.msk [vmem:[%s2253_s8 + $0x38] sm:$0xff] %vm389_vm2, %v445_v28 }
 0x149   :  { %462 = vst.msk [vmem:[%s2253_s8 + $0x40] sm:$0xff] %vm389_vm2, %v446_v25  ;;  %v425_v26 = vpop.xlane.xlu0 %424 }
 0x14a   :  { %v427_v31 = vpop.xlane.xlu1 %426  ;;  %v447_v46 = vmul.f32 0.015625, %v425_v26 }
 0x14b   :  { %v448_v5 = vmul.f32 0.015625, %v427_v31 }
 0x14c   :  { %463 = vst.msk [vmem:[%s2253_s8 + $0x48] sm:$0xff] %vm389_vm2, %v447_v46 }
 0x14d   :  { %464 = vst.msk [vmem:[%s2253_s8 + $0x50] sm:$0xff] %vm389_vm2, %v448_v5  ;;  %v429_v13 = vpop.xlane.xlu0 %428 }
 0x14e   :  { %v431_v10 = vpop.xlane.xlu1 %430  ;;  %v449_v23 = vmul.f32 0.015625, %v429_v13 }
 0x14f   :  { %v450_v12 = vmul.f32 0.015625, %v431_v10 }
 0x150   :  { %465 = vst.msk [vmem:[%s2253_s8 + $0x58] sm:$0xff] %vm389_vm2, %v449_v23 }
 0x151   :  { %466 = vst.msk [vmem:[%s2253_s8 + $0x60] sm:$0xff] %vm389_vm2, %v450_v12  ;;  %v433_v41 = vpop.xlane.xlu0 %432 }
 0x152   :  { %v435_v16 = vpop.xlane.xlu1 %434  ;;  %v451_v42 = vmul.f32 0.015625, %v433_v41 }
 0x153   :  { %v452_v38 = vmul.f32 0.015625, %v435_v16 }
 0x154   :  { %467 = vst.msk [vmem:[%s2253_s8 + $0x68] sm:$0xff] %vm389_vm2, %v451_v42 }
 0x155   :  { %468 = vst.msk [vmem:[%s2253_s8 + $0x70] sm:$0xff] %vm389_vm2, %v452_v38  ;;  %v437_v48 = vpop.xlane.xlu0 %436 }
 0x156   :  { %v487_v47 = vpop.xlane.xlu1 %486  ;;  %v453_v50 = vmul.f32 0.015625, %v437_v48 }
 0x157   :  { %518 = vst.msk [vmem:[%s2254_s9] sm:$0xff] %vm389_vm2, %v487_v47 }
 0x158   :  { %469 = vst.msk [vmem:[%s2253_s8 + $0x78] sm:$0xff] %vm389_vm2, %v453_v50 }
 0x159   :  { %v489_v57 = vpop.xlane.xlu0 %488 }
 0x15a   :  { %v491_v58 = vpop.xlane.xlu1 %490  ;;  %519 = vst.msk [vmem:[%s2254_s9 + $0x8] sm:$0xff] %vm389_vm2, %v489_v57 }
 0x15b   :  { %520 = vst.msk [vmem:[%s2254_s9 + $0x10] sm:$0xff] %vm389_vm2, %v491_v58 }
 0x15d   :  { %v493_v0 = vpop.xlane.xlu0 %492 }
 0x15e   :  { %v495_v61 = vpop.xlane.xlu1 %494  ;;  %521 = vst.msk [vmem:[%s2254_s9 + $0x18] sm:$0xff] %vm389_vm2, %v493_v0 }
 0x15f   :  { %522 = vst.msk [vmem:[%s2254_s9 + $0x20] sm:$0xff] %vm389_vm2, %v495_v61 }
 0x161   :  { %v497_v1 = vpop.xlane.xlu0 %496 }
 0x162   :  { %v499_v7 = vpop.xlane.xlu1 %498  ;;  %523 = vst.msk [vmem:[%s2254_s9 + $0x28] sm:$0xff] %vm389_vm2, %v497_v1 }
 0x163   :  { %524 = vst.msk [vmem:[%s2254_s9 + $0x30] sm:$0xff] %vm389_vm2, %v499_v7 }
 0x165   :  { %v501_v59 = vpop.xlane.xlu0 %500 }
 0x166   :  { %v503_v3 = vpop.xlane.xlu1 %502  ;;  %525 = vst.msk [vmem:[%s2254_s9 + $0x38] sm:$0xff] %vm389_vm2, %v501_v59 }
 0x167   :  { %526 = vst.msk [vmem:[%s2254_s9 + $0x40] sm:$0xff] %vm389_vm2, %v503_v3 }
 0x169   :  { %v505_v24 = vpop.xlane.xlu0 %504 }
 0x16a   :  { %v507_v11 = vpop.xlane.xlu1 %506  ;;  %527 = vst.msk [vmem:[%s2254_s9 + $0x48] sm:$0xff] %vm389_vm2, %v505_v24 }
 0x16b   :  { %528 = vst.msk [vmem:[%s2254_s9 + $0x50] sm:$0xff] %vm389_vm2, %v507_v11 }
 0x16d   :  { %v509_v33 = vpop.xlane.xlu0 %508 }
 0x16e   :  { %v511_v29 = vpop.xlane.xlu1 %510  ;;  %529 = vst.msk [vmem:[%s2254_s9 + $0x58] sm:$0xff] %vm389_vm2, %v509_v33 }
 0x16f   :  { %530 = vst.msk [vmem:[%s2254_s9 + $0x60] sm:$0xff] %vm389_vm2, %v511_v29 }
 0x171   :  { %v513_v43 = vpop.xlane.xlu0 %512 }
 0x172   :  { %v515_v39 = vpop.xlane.xlu1 %514  ;;  %531 = vst.msk [vmem:[%s2254_s9 + $0x68] sm:$0xff] %vm389_vm2, %v513_v43 }
 0x173   :  { %532 = vst.msk [vmem:[%s2254_s9 + $0x70] sm:$0xff] %vm389_vm2, %v515_v39 }
 0x175   :  { %v517_v60 = vpop.xlane.xlu0 %516 }
 0x176   :  { %v551_v45 = vpop.xlane.xlu1 %550  ;;  %533 = vst.msk [vmem:[%s2254_s9 + $0x78] sm:$0xff] %vm389_vm2, %v517_v60 }
 0x177   :  { %582 = vst.msk [vmem:[%s2255_s10] sm:$0xff] %vm389_vm2, %v551_v45 }
 0x179   :  { %v553_v63 = vpop.xlane.xlu0 %552 }
 0x17a   :  { %v555_v62 = vpop.xlane.xlu1 %554  ;;  %583 = vst.msk [vmem:[%s2255_s10 + $0x8] sm:$0xff] %vm389_vm2, %v553_v63 }
 0x17b   :  { %584 = vst.msk [vmem:[%s2255_s10 + $0x10] sm:$0xff] %vm389_vm2, %v555_v62 }
 0x17d   :  { %v557_v9 = vpop.xlane.xlu0 %556 }
 0x17e   :  { %v559_v52 = vpop.xlane.xlu1 %558  ;;  %585 = vst.msk [vmem:[%s2255_s10 + $0x18] sm:$0xff] %vm389_vm2, %v557_v9 }
 0x17f   :  { %586 = vst.msk [vmem:[%s2255_s10 + $0x20] sm:$0xff] %vm389_vm2, %v559_v52 }
 0x181   :  { %v561_v32 = vpop.xlane.xlu0 %560 }
 0x182   :  { %v563_v21 = vpop.xlane.xlu1 %562  ;;  %587 = vst.msk [vmem:[%s2255_s10 + $0x28] sm:$0xff] %vm389_vm2, %v561_v32 }
 0x183   :  { %588 = vst.msk [vmem:[%s2255_s10 + $0x30] sm:$0xff] %vm389_vm2, %v563_v21 }
 0x185   :  { %v565_v53 = vpop.xlane.xlu0 %564 }
 0x186   :  { %v567_v34 = vpop.xlane.xlu1 %566  ;;  %589 = vst.msk [vmem:[%s2255_s10 + $0x38] sm:$0xff] %vm389_vm2, %v565_v53 }
 0x187   :  { %590 = vst.msk [vmem:[%s2255_s10 + $0x40] sm:$0xff] %vm389_vm2, %v567_v34 }
 0x189   :  { %v569_v40 = vpop.xlane.xlu0 %568 }
 0x18a   :  { %v571_v56 = vpop.xlane.xlu1 %570  ;;  %591 = vst.msk [vmem:[%s2255_s10 + $0x48] sm:$0xff] %vm389_vm2, %v569_v40 }
 0x18b   :  { %592 = vst.msk [vmem:[%s2255_s10 + $0x50] sm:$0xff] %vm389_vm2, %v571_v56 }
 0x18d   :  { %v573_v36 = vpop.xlane.xlu0 %572 }
 0x18e   :  { %v575_v14 = vpop.xlane.xlu1 %574  ;;  %593 = vst.msk [vmem:[%s2255_s10 + $0x58] sm:$0xff] %vm389_vm2, %v573_v36 }
 0x18f   :  { %594 = vst.msk [vmem:[%s2255_s10 + $0x60] sm:$0xff] %vm389_vm2, %v575_v14 }
 0x191   :  { %v577_v35 = vpop.xlane.xlu0 %576 }
 0x192   :  { %v579_v17 = vpop.xlane.xlu1 %578  ;;  %595 = vst.msk [vmem:[%s2255_s10 + $0x68] sm:$0xff] %vm389_vm2, %v577_v35 }
 0x193   :  { %596 = vst.msk [vmem:[%s2255_s10 + $0x70] sm:$0xff] %vm389_vm2, %v579_v17 }
 0x195   :  { %v581_v54 = vpop.xlane.xlu0 %580 }
 0x196   :  { %v615_v49 = vpop.xlane.xlu1 %614  ;;  %597 = vst.msk [vmem:[%s2255_s10 + $0x78] sm:$0xff] %vm389_vm2, %v581_v54 }
 0x197   :  { %646 = vst.msk [vmem:[%s2256_s11] sm:$0xff] %vm389_vm2, %v615_v49 }
 0x199   :  { %v617_v22 = vpop.xlane.xlu0 %616 }
 0x19a   :  { %v619_v8 = vpop.xlane.xlu1 %618  ;;  %647 = vst.msk [vmem:[%s2256_s11 + $0x8] sm:$0xff] %vm389_vm2, %v617_v22 }
 0x19b   :  { %648 = vst.msk [vmem:[%s2256_s11 + $0x10] sm:$0xff] %vm389_vm2, %v619_v8 }
 0x19d   :  { %v621_v27 = vpop.xlane.xlu0 %620 }
 0x19e   :  { %v623_v15 = vpop.xlane.xlu1 %622  ;;  %649 = vst.msk [vmem:[%s2256_s11 + $0x18] sm:$0xff] %vm389_vm2, %v621_v27 }
 0x19f   :  { %650 = vst.msk [vmem:[%s2256_s11 + $0x20] sm:$0xff] %vm389_vm2, %v623_v15 }
 0x1a1   :  { %v625_v55 = vpop.xlane.xlu0 %624 }
 0x1a2   :  { %v627_v20 = vpop.xlane.xlu1 %626  ;;  %651 = vst.msk [vmem:[%s2256_s11 + $0x28] sm:$0xff] %vm389_vm2, %v625_v55 }
 0x1a3   :  { %652 = vst.msk [vmem:[%s2256_s11 + $0x30] sm:$0xff] %vm389_vm2, %v627_v20 }
 0x1a5   :  { %v629_v37 = vpop.xlane.xlu0 %628 }
 0x1a6   :  { %v631_v2 = vpop.xlane.xlu1 %630  ;;  %653 = vst.msk [vmem:[%s2256_s11 + $0x38] sm:$0xff] %vm389_vm2, %v629_v37 }
 0x1a7   :  { %654 = vst.msk [vmem:[%s2256_s11 + $0x40] sm:$0xff] %vm389_vm2, %v631_v2 }
 0x1a9   :  { %v633_v44 = vpop.xlane.xlu0 %632 }
 0x1aa   :  { %v635_v6 = vpop.xlane.xlu1 %634  ;;  %655 = vst.msk [vmem:[%s2256_s11 + $0x48] sm:$0xff] %vm389_vm2, %v633_v44 }
 0x1ab   :  { %656 = vst.msk [vmem:[%s2256_s11 + $0x50] sm:$0xff] %vm389_vm2, %v635_v6 }
 0x1ad   :  { %v637_v30 = vpop.xlane.xlu0 %636 }
 0x1ae   :  { %v639_v4 = vpop.xlane.xlu1 %638  ;;  %657 = vst.msk [vmem:[%s2256_s11 + $0x58] sm:$0xff] %vm389_vm2, %v637_v30 }
 0x1af   :  { %658 = vst.msk [vmem:[%s2256_s11 + $0x60] sm:$0xff] %vm389_vm2, %v639_v4 }
 0x1b1   :  { %v641_v19 = vpop.xlane.xlu0 %640 }
 0x1b2   :  { %v643_v18 = vpop.xlane.xlu1 %642  ;;  %659 = vst.msk [vmem:[%s2256_s11 + $0x68] sm:$0xff] %vm389_vm2, %v641_v19 }
 0x1b3   :  { %660 = vst.msk [vmem:[%s2256_s11 + $0x70] sm:$0xff] %vm389_vm2, %v643_v18 }
 0x1b5   :  { %v645_v51 = vpop.xlane.xlu0 %644 }
 0x1b6   :  { %661 = vst.msk [vmem:[%s2256_s11 + $0x78] sm:$0xff] %vm389_vm2, %v645_v51 }

</bundles_post_ra>
